<compile_context>
chip_gen: v6e
topology: v6e:2x2x1
jax: 0.10.0
libtpu: 0.0.40
codegen_flags: <defaults>
</compile_context>

<pallas_src>
import jax
import jax.numpy as jnp
from jax import lax
from jax.experimental import pallas as pl
from jax.experimental.pallas import tpu as pltpu


def tfam_kernel(x1_ref, x2_ref, w1_ref, b1_ref, w2_ref, b2_ref, out_ref):
    # x1_ref / out_ref : (1, c, tq)  -- one query-position tile of one batch
    # x2_ref           : (1, c, hw)  -- full key/value slab (resident)
    # w1_ref / w2_ref  : (c, c)      -- 1x1 conv weights
    # b1_ref / b2_ref  : (c, 1)      -- conv biases (broadcast over positions)
    x1 = x1_ref[0]                          # (c, tq), input dtype
    x2 = x2_ref[0]                          # (c, hw), input dtype
    cdt = x1.dtype                          # MXU operand dtype (bf16 stays bf16)

    # 1x1 convs == channel matmuls on the MXU, f32 accumulation.
    q = (jnp.dot(w1_ref[...].astype(cdt), x1,
                 preferred_element_type=jnp.float32) + b1_ref[...]).astype(cdt)   # (c, tq)
    k = (jnp.dot(w2_ref[...].astype(cdt), x2,
                 preferred_element_type=jnp.float32) + b2_ref[...]).astype(cdt)   # (c, hw)

    # energy[i, j] = sum_c q[c, i] * k[c, j]  -- contract the channel dims
    # directly; the MXU consumes the "transposed" operand for free.
    energy = lax.dot_general(
        q, k, dimension_numbers=(((0,), (0,)), ((), ())),
        preferred_element_type=jnp.float32)                                        # (tq, hw)

    # Softmax numerator (row-wise, f32 elementwise math), normalization deferred.
    energy = energy - jnp.max(energy, axis=-1, keepdims=True)
    e = jnp.exp(energy)                                                            # (tq, hw)
    denom = jnp.sum(e, axis=-1, keepdims=True)                                     # (tq, 1)

    # out_unnorm[c, i] = sum_j x2[c, j] * e[i, j]  -- contract key dims directly
    # (== value @ attn^T without materializing attn or its transpose).
    out_un = lax.dot_general(
        x2, e.astype(cdt), dimension_numbers=(((1,), (1,)), ((), ())),
        preferred_element_type=jnp.float32)                                        # (c, tq)

    # Deferred normalization: c*tq multiplies, reciprocal on the EUP.
    inv = pl.reciprocal(denom, approx=True)                                        # (tq, 1)
    out_ref[0] = (out_un * jnp.transpose(inv)).astype(out_ref.dtype)


def _pick_query_tile(hw):
    """Largest 128-aligned query tile dividing hw, with the (energy + exp)
    f32 slab capped at ~16 MiB so it fits comfortably on v7x (64 MiB VMEM)."""
    budget = max(128, (16 * 1024 * 1024) // (8 * hw))
    for cand in (512, 256, 128):
        if cand <= budget and hw % cand == 0:
            return cand
    return hw  # small / oddly-shaped hw: fall back to untiled query dim


def tfam_forward(x1, x2, w1, b1, w2, b2):
    """x1, x2: (b, c, h, w) NCHW.  Returns (b, c, h, w)."""
    b, c, h, w = x1.shape
    hw = h * w
    x1f = x1.reshape(b, c, hw)
    x2f = x2.reshape(b, c, hw)
    b1c = b1.reshape(c, 1).astype(jnp.float32)
    b2c = b2.reshape(c, 1).astype(jnp.float32)

    tq = _pick_query_tile(hw)
    n_q = hw // tq
    itemsize = jnp.dtype(x1.dtype).itemsize

    # VMEM budget: energy + exp f32 slabs + double-buffered x1/x2/out blocks.
    vmem_need = (
        2 * tq * hw * 4
        + 2 * c * hw * itemsize * 2
        + 4 * c * tq * itemsize * 2
        + 4 * c * c * itemsize
        + (1 << 20)
    )
    vmem_limit = int(min(max(2 * vmem_need, 32 * 1024 * 1024), 48 * 1024 * 1024))

    cost = pl.CostEstimate(
        flops=int(b * (4 * c * c * hw + 4 * c * hw * hw)),
        transcendentals=int(b * hw * hw),
        bytes_accessed=int((3 * b * c * hw + 2 * c * c + 2 * c) * itemsize),
    )

    out = pl.pallas_call(
        tfam_kernel,
        out_shape=jax.ShapeDtypeStruct((b, c, hw), x1.dtype),
        grid_spec=pltpu.PrefetchScalarGridSpec(
            num_scalar_prefetch=0,
            grid=(b, n_q),
            in_specs=[
                pl.BlockSpec((1, c, tq), lambda bi, qi: (bi, 0, qi)),   # x1 (query tile)
                pl.BlockSpec((1, c, hw), lambda bi, qi: (bi, 0, 0)),    # x2 (resident K/V)
                pl.BlockSpec((c, c), lambda bi, qi: (0, 0)),            # w1
                pl.BlockSpec((c, 1), lambda bi, qi: (0, 0)),            # b1
                pl.BlockSpec((c, c), lambda bi, qi: (0, 0)),            # w2
                pl.BlockSpec((c, 1), lambda bi, qi: (0, 0)),            # b2
            ],
            out_specs=pl.BlockSpec((1, c, tq), lambda bi, qi: (bi, 0, qi)),
        ),
        compiler_params=pltpu.CompilerParams(
            dimension_semantics=("parallel", "parallel"),
            vmem_limit_bytes=vmem_limit,
        ),
        cost_estimate=cost,
    )(x1f, x2f, w1, b1c, w2, b2c)
    return out.reshape(b, c, h, w)


def tfam_reference(x1, x2, w1, b1, w2, b2):
    """Pure-JAX reference mirroring the PyTorch forward."""
    b, c, h, w = x1.shape
    hw = h * w
    x1f = x1.reshape(b, c, hw)
    x2f = x2.reshape(b, c, hw)
    q = jnp.einsum('oc,bcp->bop', w1, x1f) + b1[None, :, None]     # conv1(x1) flat
    k = jnp.einsum('oc,bcp->bop', w2, x2f) + b2[None, :, None]     # conv2(x2) flat
    query = jnp.transpose(q, (0, 2, 1))                            # (b, hw, c)
    energy = jnp.einsum('bpc,bcq->bpq', query, k)                  # (b, hw, hw)
    attn = jax.nn.softmax(energy, axis=-1)
    out = jnp.einsum('bcp,bqp->bcq', x2f, attn)                    # value @ attn^T
    return out.reshape(b, c, h, w)


if __name__ == "__main__":
    key = jax.random.PRNGKey(0)
    kx1, kx2, kw1, kb1, kw2, kb2 = jax.random.split(key, 6)

    B, C, H, W = 2, 4, 16, 16
    x1 = jax.random.normal(kx1, (B, C, H, W), dtype=jnp.float32)
    x2 = jax.random.normal(kx2, (B, C, H, W), dtype=jnp.float32)

    # Deterministic synthetic parameters (Conv2d(channels, channels, 1)).
    w1 = jax.random.normal(kw1, (C, C), dtype=jnp.float32) * 0.2
    b1 = jax.random.normal(kb1, (C,), dtype=jnp.float32) * 0.1
    w2 = jax.random.normal(kw2, (C, C), dtype=jnp.float32) * 0.2
    b2 = jax.random.normal(kb2, (C,), dtype=jnp.float32) * 0.1

    out = tfam_forward(x1, x2, w1, b1, w2, b2)
    jax.block_until_ready(out)

    ref = tfam_reference(x1, x2, w1, b1, w2, b2)
    assert out.shape == (B, C, H, W)
    # Tolerance slightly loosened for the approximate (EUP) reciprocal in the
    # deferred softmax normalization.
    max_err = float(jnp.max(jnp.abs(out - ref)))
    assert jnp.allclose(out, ref, atol=5e-3, rtol=5e-3), f"mismatch vs reference (max abs err {max_err})"

    print("KERNEL_OK")
</pallas_src>

<mosaic_0001>
module attributes {stable_mosaic.version = 11 : i64} {
  func.func @tfam_kernel(%arg0: i32, %arg1: i32, %arg2: memref<1x4x256xf32, #tpu.memory_space<vmem>>, %arg3: memref<1x4x256xf32, #tpu.memory_space<vmem>>, %arg4: memref<4x4xf32, #tpu.memory_space<vmem>>, %arg5: memref<4x1xf32, #tpu.memory_space<vmem>>, %arg6: memref<4x4xf32, #tpu.memory_space<vmem>>, %arg7: memref<4x1xf32, #tpu.memory_space<vmem>>, %arg8: memref<1x4x256xf32, #tpu.memory_space<vmem>>) attributes {dimension_semantics = [#tpu.dimension_semantics<parallel>, #tpu.dimension_semantics<parallel>], iteration_bounds = array<i64: 2, 1>, scalar_prefetch = 0 : i64, scratch_operands = 0 : i64, tpu.core_type = #tpu.core_type<tc>, window_params = [{transform_indices = @transform_0, window_bounds = array<i64: 1, 4, 256>}, {transform_indices = @transform_1, window_bounds = array<i64: 1, 4, 256>}, {pipeline_mode = #tpu.pipeline_mode<synchronous>, transform_indices = @transform_2, window_bounds = array<i64: 4, 4>}, {pipeline_mode = #tpu.pipeline_mode<synchronous>, transform_indices = @transform_3, window_bounds = array<i64: 4, 1>}, {pipeline_mode = #tpu.pipeline_mode<synchronous>, transform_indices = @transform_4, window_bounds = array<i64: 4, 4>}, {pipeline_mode = #tpu.pipeline_mode<synchronous>, transform_indices = @transform_5, window_bounds = array<i64: 4, 1>}, {transform_indices = @transform_6, window_bounds = array<i64: 1, 4, 256>}]} {
    %c0 = arith.constant 0 : index
    %c0_0 = arith.constant 0 : index
    %c0_1 = arith.constant 0 : index
    %0 = vector.load %arg2[%c0, %c0_0, %c0_1] : memref<1x4x256xf32, #tpu.memory_space<vmem>>, vector<1x4x256xf32>
    %1 = vector.shape_cast %0 : vector<1x4x256xf32> to vector<4x256xf32>
    %c0_2 = arith.constant 0 : index
    %c0_3 = arith.constant 0 : index
    %c0_4 = arith.constant 0 : index
    %2 = vector.load %arg3[%c0_2, %c0_3, %c0_4] : memref<1x4x256xf32, #tpu.memory_space<vmem>>, vector<1x4x256xf32>
    %3 = vector.shape_cast %2 : vector<1x4x256xf32> to vector<4x256xf32>
    %c0_5 = arith.constant 0 : index
    %c0_6 = arith.constant 0 : index
    %4 = vector.load %arg4[%c0_5, %c0_6] : memref<4x4xf32, #tpu.memory_space<vmem>>, vector<4x4xf32>
    %cst = arith.constant dense<0.000000e+00> : vector<4x256xf32>
    %5 = tpu.matmul %4, %1, %cst {dimension_numbers = #tpu.dot_dimension_numbers<[1], [0], [0], [1], [0, 0, 1, 1], [], []>} : vector<4x4xf32>, vector<4x256xf32>, vector<4x256xf32> -> vector<4x256xf32>
    %c0_7 = arith.constant 0 : index
    %c0_8 = arith.constant 0 : index
    %6 = vector.load %arg5[%c0_7, %c0_8] : memref<4x1xf32, #tpu.memory_space<vmem>>, vector<4x1xf32>
    %7 = vector.broadcast %6 : vector<4x1xf32> to vector<4x256xf32>
    %8 = arith.addf %5, %7 : vector<4x256xf32>
    %c0_9 = arith.constant 0 : index
    %c0_10 = arith.constant 0 : index
    %9 = vector.load %arg6[%c0_9, %c0_10] : memref<4x4xf32, #tpu.memory_space<vmem>>, vector<4x4xf32>
    %cst_11 = arith.constant dense<0.000000e+00> : vector<4x256xf32>
    %10 = tpu.matmul %9, %3, %cst_11 {dimension_numbers = #tpu.dot_dimension_numbers<[1], [0], [0], [1], [0, 0, 1, 1], [], []>} : vector<4x4xf32>, vector<4x256xf32>, vector<4x256xf32> -> vector<4x256xf32>
    %c0_12 = arith.constant 0 : index
    %c0_13 = arith.constant 0 : index
    %11 = vector.load %arg7[%c0_12, %c0_13] : memref<4x1xf32, #tpu.memory_space<vmem>>, vector<4x1xf32>
    %12 = vector.broadcast %11 : vector<4x1xf32> to vector<4x256xf32>
    %13 = arith.addf %10, %12 : vector<4x256xf32>
    %cst_14 = arith.constant dense<0.000000e+00> : vector<256x256xf32>
    %14 = tpu.matmul %8, %13, %cst_14 {dimension_numbers = #tpu.dot_dimension_numbers<[0], [0], [1], [1], [0, 1, 1, 1], [], []>} : vector<4x256xf32>, vector<4x256xf32>, vector<256x256xf32> -> vector<256x256xf32>
    %cst_15 = arith.constant dense<0xFF800000> : vector<256xf32>
    %15 = vector.multi_reduction <maximumf>, %14, %cst_15 [1] : vector<256x256xf32> to vector<256xf32>
    %16 = vector.shape_cast %15 : vector<256xf32> to vector<256x1xf32>
    %17 = vector.broadcast %16 : vector<256x1xf32> to vector<256x256xf32>
    %18 = arith.subf %14, %17 : vector<256x256xf32>
    %19 = math.exp %18 : vector<256x256xf32>
    %cst_16 = arith.constant dense<0.000000e+00> : vector<256xf32>
    %20 = vector.multi_reduction <add>, %19, %cst_16 [1] : vector<256x256xf32> to vector<256xf32>
    %21 = vector.shape_cast %20 : vector<256xf32> to vector<256x1xf32>
    %cst_17 = arith.constant dense<0.000000e+00> : vector<4x256xf32>
    %22 = tpu.matmul %3, %19, %cst_17 {dimension_numbers = #tpu.dot_dimension_numbers<[1], [1], [0], [0], [0, 0, 1, 0], [], []>} : vector<4x256xf32>, vector<256x256xf32>, vector<4x256xf32> -> vector<4x256xf32>
    %23 = tpu.reciprocal %21 {approx = true} : vector<256x1xf32> -> vector<256x1xf32>
    %24 = tpu.transpose %23, [1, 0] : vector<256x1xf32> -> vector<1x256xf32>
    %25 = vector.broadcast %24 : vector<1x256xf32> to vector<4x256xf32>
    %26 = arith.mulf %22, %25 : vector<4x256xf32>
    %c0_18 = arith.constant 0 : index
    %c0_19 = arith.constant 0 : index
    %c0_20 = arith.constant 0 : index
    %27 = vector.load %arg8[%c0_18, %c0_19, %c0_20] : memref<1x4x256xf32, #tpu.memory_space<vmem>>, vector<1x4x256xf32>
    %28 = vector.shape_cast %27 : vector<1x4x256xf32> to vector<4x256xf32>
    %29 = vector.shape_cast %26 : vector<4x256xf32> to vector<1x4x256xf32>
    tpu.vector_store %arg8[%c0_18, %c0_19, %c0_20], %29 {strides = array<i32>} : memref<1x4x256xf32, #tpu.memory_space<vmem>>, vector<1x4x256xf32>,
    return
  }
  func.func @transform_0(%arg0: i32, %arg1: i32) -> (i32, i32, i32) {
    %c0_i32 = arith.constant 0 : i32
    %c0_i32_0 = arith.constant 0 : i32
    return %arg0, %c0_i32, %arg1 : i32, i32, i32
  }
  func.func @transform_1(%arg0: i32, %arg1: i32) -> (i32, i32, i32) {
    %c0_i32 = arith.constant 0 : i32
    %c0_i32_0 = arith.constant 0 : i32
    %c0_i32_1 = arith.constant 0 : i32
    return %arg0, %c0_i32, %c0_i32_0 : i32, i32, i32
  }
  func.func @transform_2(%arg0: i32, %arg1: i32) -> (i32, i32) {
    %c0_i32 = arith.constant 0 : i32
    %c0_i32_0 = arith.constant 0 : i32
    %c0_i32_1 = arith.constant 0 : i32
    return %c0_i32, %c0_i32_0 : i32, i32
  }
  func.func @transform_3(%arg0: i32, %arg1: i32) -> (i32, i32) {
    %c0_i32 = arith.constant 0 : i32
    %c0_i32_0 = arith.constant 0 : i32
    %c0_i32_1 = arith.constant 0 : i32
    return %c0_i32, %c0_i32_0 : i32, i32
  }
  func.func @transform_4(%arg0: i32, %arg1: i32) -> (i32, i32) {
    %c0_i32 = arith.constant 0 : i32
    %c0_i32_0 = arith.constant 0 : i32
    %c0_i32_1 = arith.constant 0 : i32
    return %c0_i32, %c0_i32_0 : i32, i32
  }
  func.func @transform_5(%arg0: i32, %arg1: i32) -> (i32, i32) {
    %c0_i32 = arith.constant 0 : i32
    %c0_i32_0 = arith.constant 0 : i32
    %c0_i32_1 = arith.constant 0 : i32
    return %c0_i32, %c0_i32_0 : i32, i32
  }
  func.func @transform_6(%arg0: i32, %arg1: i32) -> (i32, i32, i32) {
    %c0_i32 = arith.constant 0 : i32
    %c0_i32_0 = arith.constant 0 : i32
    return %arg0, %c0_i32, %arg1 : i32, i32, i32
  }
}

</mosaic_0001>

<bundles_post_ra>
// kernel: tpu_custom_call.1
= control target key start
LH: loop header
LB: loop body
LE: loop exit
PB: predicated region body
PF: predicated region fallthrough
CT: control target
= control target key end

     0   :  { %s2726_s0 = inlined_call_operand.hbm [shape: f32[2,4,256], index: 0, kind: input, shape index: {}]   ;;  %s2727_s1 = inlined_call_operand.hbm [shape: f32[2,4,256], index: 1, kind: input, shape index: {}]   ;;  %s2728_s2 = inlined_call_operand.vmem [shape: f32[4,4], index: 2, kind: input, shape index: {}]   ;;  %s2729_s3 = inlined_call_operand.vmem [shape: f32[4,1], index: 3, kind: input, shape index: {}]   ;;  %s2730_s4 = inlined_call_operand.vmem [shape: f32[4,4], index: 4, kind: input, shape index: {}]   ;;  %s2731_s5 = inlined_call_operand.vmem [shape: f32[4,1], index: 5, kind: input, shape index: {}]   ;;  %s2732_s6 = inlined_call_operand.hbm [shape: f32[2,4,256], index: 6, kind: output, shape index: {}]  }
   0x1   :  { %2747 = sst [smem:[#allocation25_spill]] %s2726_s0 }
   0x2   :  { %11 = vsyncpa [#allocation3], 0 }
   0x3   :  { %13 = vsyncpa [#allocation3 + $0x1], 0 }
   0x4   :  { %14 = vsyncpa [#allocation6], 0 }
   0x5   :  { %16 = vsyncpa [#allocation6 + $0x1], 0 }
   0x6   :  { %17 = vsyncpa [#allocation4], 0 }
   0x7   :  { %19 = vsyncpa [#allocation4 + $0x1], 0  ;;  %s2127_s21 = smov 0   ;;  %s2129_s22 = smov 0  }
   0x8   :  { %s2131_s23 = smov 0   ;;  %s2133_s24 = smov 0  }
   0x9   :  { %s2135_s25 = smov 0   ;;  %s2137_s26 = smov 0  }
   0xa LB: > { %s1618_s27 = sadd.s32 4294967295, %s2085_s26   ;;  %s1619_s28 = sadd.s32 4294967294, %s2085_s26   ;;  %s2085_s26 = sphi %s2137_s26, %s25_s26   ;;  %s2081_s25 = sphi %s2135_s25, %s2788_s25   ;;  %s2077_s24 = sphi %s2133_s24, %s2787_s24   ;;  %s2073_s23 = sphi %s2131_s23, %s2786_s23   ;;  %s2069_s22 = sphi %s2129_s22, %s2785_s22   ;;  %s2065_s21 = sphi %s2127_s21, %s2784_s21  }
   0xb   : > { %s37_s29 = sadd.s32 1, %s2081_s25  ;;  %s46_s30 = sadd.s32 1, %s2073_s23 }
   0xc   : > { %p39_p0 = scmp.ge.s32.totalorder %s37_s29, 2  ;;  %p53_p1 = scmp.ne.s32.totalorder %s2073_s23, %s2069_s22 }
   0xd   : > { %p54_p2 = scmp.eq.s32.totalorder %s2085_s26, 0  ;;  %p59_p3 = scmp.ne.s32.totalorder %s2069_s22, %s2065_s21 }
   0xe   : > { %s2790_s29 = smov (%p39_p0, %s37_s29), 0  ;;  %p60_p5 = scmp.eq.s32.totalorder %s1618_s27, 0 }
   0xf   : > { %2748 = sst [smem:[#allocation11_spill]] %s2790_s29  ;;  %p2168_p4 = por %p54_p2, %p53_p1 }
  0x10   : > { %s41_s8 = ssub.s32 %s2081_s25, %s2790_s29  ;;  %p195_p6 = scmp.eq.s32.totalorder %s1618_s27, 1 }
  0x11   : > { %p44_p7 = scmp.eq.s32.totalorder %s41_s8, 0  ;;  %p2174_p8 = por %p60_p5, %p59_p3 }
  0x12   : > { %p2178_p9 = por %p195_p6, %p53_p1  ;;  %p201_p10 = scmp.eq.s32.totalorder %s1619_s28, 1 }
  0x13   : > { %s2183_s11 = scalar_select %p44_p7, %s2073_s23, %s46_s30  }
  0x14   : > { %p2185_p11 = por %p201_p10, %p59_p3  ;;  %p1697_p13 = scmp.lt.s32.totalorder %s2085_s26, 2 }
  0x15   : > { %s2192_s13 = sand.u32 1, %s2073_s23   ;;  %s1677_s15 = sshll.u32 %s2081_s25, 7 }
  0x16   : > { %s1622_s14 = sshll.u32 %s2192_s13, 3  ;;  %s2753_s0 = sld [smem:[#allocation25_spill]] }
  0x17   : > { %s237_s19 = scalar_lea.vmem [#allocation2], %s1622_s14  ;;  %p2201_p0 = pnand %p1697_p13, %p2168_p4 }
  0x18   : > { %s247_s20 = sshll.u32 %s237_s19, 4  ;;  %p1628_p1 = scmp.ge.s32.totalorder %s2085_s26, 1  ;;  %s248_s20 = int_to_ptr.vmem [resolvable:$true] %s247_s20 }
  0x19   : > { %p271_p2 = scmp.lt.s32.totalorder %s2085_s26, 3  ;;  %s234_s28 = scalar_lea.sflag [#allocation3], %s2192_s13 }
  0x1a   : > { %p1947_p3 = pneg %p2201_p0  ;;  %s1958_s30 = scalar_lea.vmem %s248_s20, 128 }
  0x1b   : > { %p1959_p5 = scmp.ne.s32.totalorder %s248_s20, %s1958_s30  ;;  %s2087_s8 = smov [#allocation2]  }
  0x1c   : > { %s245_s18 = scalar_lea.hbm %s2753_s0, %s1677_s15  ;;  %s1963_s16 = sshll.u32 %s2087_s8, 4  ;;  %s1964_s16 = int_to_ptr.vmem [resolvable:$false] %s1963_s16 }
  0x1d   : > { %p1961_p6 = pnand %p1959_p5, %p1947_p3  ;;  %s1965_s7 = scalar_lea.vmem %s1964_s16, 256 }
  0x1e   : > { %p1966_p4 = scmp.lt.s32.totalorder %s248_s20, %s1964_s16  ;;  %p1967_p10 = scmp.lt.s32.totalorder %s1965_s7, %s1958_s30 }
  0x1f   : > { %p1962_p7 = pneg %p1961_p6 }
  0x20   : > { %p1968_p13 = por %p1967_p10, %p1966_p4 }
  0x22   : > { %p1969_p12 = pnand %p1968_p13, %p1962_p7 }
  0x24   : > { %1972 = shalt.err (!%p1969_p12)
}
  0x25   : > { %1689 = dma.hbm_to_vmem [thread:$0]  (!%p2201_p0), %s245_s18, 128, %s248_s20, %s234_s28  }
  0x26   : > { %p2219_p5 = pnand %p1628_p1, %p271_p2  ;;  %s264_s30 = scalar_lea.hbm %s2727_s1, %s1677_s15 }
  0x27   : > { %s258_s16 = scalar_lea.vmem [#allocation5], %s1622_s14  ;;  %s255_s0 = scalar_lea.sflag [#allocation6], %s2192_s13 }
  0x28   : > { %s266_s7 = sshll.u32 %s258_s16, 4  ;;  %s2088_s18 = smov [#allocation5]   ;;  %s267_s7 = int_to_ptr.vmem [resolvable:$true] %s266_s7 }
  0x29   : > { %s1986_s29 = scalar_lea.vmem %s267_s7, 128  ;;  %s1991_s20 = sshll.u32 %s2088_s18, 4  ;;  %s1992_s20 = int_to_ptr.vmem [resolvable:$false] %s1991_s20 }
  0x2a   : > { %p1987_p12 = scmp.ne.s32.totalorder %s267_s7, %s1986_s29  ;;  %s1993_s28 = scalar_lea.vmem %s1992_s20, 256 }
  0x2b   : > { %p1994_p1 = scmp.lt.s32.totalorder %s267_s7, %s1992_s20  ;;  %p1995_p2 = scmp.lt.s32.totalorder %s1993_s28, %s1986_s29 }
  0x2c   : > { %p1989_p6 = pnand %p1987_p12, %p1947_p3 }
  0x2d   : > { %p1996_p4 = por %p1995_p2, %p1994_p1 }
  0x2e   : > { %p1990_p7 = pneg %p1989_p6 }
  0x30   : > { %p1997_p10 = pnand %p1996_p4, %p1990_p7 }
  0x32   : > { %2000 = shalt.err (!%p1997_p10)
}
  0x33   : > { %1692 = dma.hbm_to_vmem [thread:$0]  (!%p2201_p0), %s264_s30, 128, %s267_s7, %s255_s0  }
  0x34   : > { %275 = sbr.rel (%p2219_p5) target bundleno = 1224 (0x4c8), region = 44 }
  0x39   : > { %s2235_s13 = sand.u32 1, %s2069_s22  }
  0x3a   : > { %s2238_s14 = sshll.u32 %s2235_s13, 3  ;;  %s278_s15 = scalar_lea.sflag [#allocation3], %s2235_s13 }
  0x3b   : > { %s281_s29 = scalar_lea.vmem [#allocation2], %s2238_s14 }
  0x3c   : > { %2052 = dma.done.wait (%p2174_p8), %s278_s15, 128  }
  0x3d   : > { %2054 = vsyncadd (%p2174_p8), %s278_s15, 4294967168  ;;  %s287_s0 = scalar_lea.sflag [#allocation6], %s2235_s13  ;;  %s290_s27 = scalar_lea.vmem [#allocation5], %s2238_s14 }
  0x3e   : > { %2056 = dma.done.wait (%p2174_p8), %s287_s0, 128  }
  0x3f   : > { %2058 = vsyncadd (%p2174_p8), %s287_s0, 4294967168  ;;  %v2089_v0 = vmov 0.0   ;;  %v2090_v1 = vmov 0   ;;  %v326_v2 = vld [vmem:[%s281_s29] sm:$0xff]  ;;  %vm341_vm0 = vcmask 1043456   ;;  %v327_v3 = vld [vmem:[%s290_s27] sm:$0xff] }
  0x40   : > { %410 = vmatprep.mubr.f32.mxu0 %v2089_v0  ;;  %497 = vmatprep.mubr.f32.mxu1 %v2089_v0  ;;  %v336_v4 = vcombine.high %v326_v2, %v326_v2  ;;  %v425_v5 = vcombine.high %v327_v3, %v327_v3  ;;  %v329_v6 = vld [vmem:[%s2729_s3] sm:$0xf]  ;;  %vm337_vm1 = vcmask 31744   ;;  %s1679_s20 = sshll.u32 %s2077_s24, 7  ;;  %s323_s28 = scalar_lea.vmem [#allocation7], %s2238_s14 }
  0x41   : > { %1749 = vset.pattern.permute.xlu0 %v2090_v1  ;;  %v328_v7 = vld [vmem:[%s2728_s2] sm:$0xf]  ;;  %s1511_s15 = sshll.u32 %s323_s28, 4  ;;  %s1495_s17 = scalar_lea.sflag [#allocation4], %s2235_s13  ;;  %s1512_s15 = int_to_ptr.vmem [resolvable:$true] %s1511_s15 }
  0x42   : > { %v417_v8 = vld [vmem:[%s2730_s4] sm:$0xf]  ;;  %332 = vperm.xlu0 %1749, %v329_v6   ;;  %1632 = vmatprep.subr.msk.mxu0 %vm341_vm0, %v336_v4  ;;  %s2001_s19 = scalar_lea.vmem %s1512_s15, 128  ;;  %s2091_s9 = smov [#allocation7]  }
  0x43   : > { %1635 = vmatprep.subr.msk.mxu1 %vm341_vm0, %v425_v5  ;;  %v418_v9 = vld [vmem:[%s2731_s5] sm:$0xf]  ;;  %1633 = vmatpush1.msk.msra.mxu0 %vm341_vm0, %v326_v2  ;;  %p2002_p8 = scmp.ne.s32.totalorder %s1512_s15, %s2001_s19  ;;  %s2005_s8 = sshll.u32 %s2091_s9, 4  ;;  %s2006_s8 = int_to_ptr.vmem [resolvable:$false] %s2005_s8 }
  0x44   : > { %1636 = vmatpush1.msk.msra.mxu1 %vm341_vm0, %v327_v3  ;;  %1634 = vmatmul.mubr.msk.f32.vlgmr.msra.gmra.mxu0 %vm337_vm1, %v328_v7  ;;  %s2007_s24 = scalar_lea.vmem %s2006_s8, 256  ;;  %p2008_p13 = scmp.lt.s32.totalorder %s1512_s15, %s2006_s8 }
  0x45   : > { %1637 = vmatmul.mubr.msk.f32.vlgmr.msra.gmra.mxu1 %vm337_vm1, %v417_v8  ;;  %734 = vmatprep.mubr.f32.mxu0 %v2089_v0  ;;  %p2003_p0 = pnand %p2002_p8, %p2178_p9  ;;  %p2009_p5 = scmp.lt.s32.totalorder %s2007_s24, %s2001_s19 }
  0x46   : > { %421 = vperm.xlu0 %1749, %v418_v9   ;;  %1376 = vmatprep.mubr.f32.mxu1 %v425_v5 }
  0x47   : > { %p2004_p3 = pneg %p2003_p0  ;;  %p2010_p12 = por %p2009_p5, %p2008_p13 }
  0x49   : > { %p2011_p6 = pnand %p2010_p12, %p2004_p3 }
  0xbd   : > { %v333_v10 = vpop.permute.xlu0 %332 }
  0xc1   : > { %v422_v13 = vpop.permute.xlu0 %421 }
 0x104   : > { %v412_v11 = vpop.f32.mrf.mxu0 }
 0x105   : > { %v499_v12 = vpop.f32.mrf.mxu1  ;;  %v413_v14 = vadd.f32 %v412_v11, %v333_v10 }
 0x106   : > { %v500_v17 = vadd.f32 %v499_v12, %v422_v13  ;;  %v414_v18 = vpop.f32.mrf.mxu0 }
 0x107   : > { %v501_v15 = vpop.f32.mrf.mxu1  ;;  %504 = vxpose.xlu1.b32.start.end [1/1] (short) %v413_v14, 128  ;;  %v415_v19 = vadd.f32 %v414_v18, %v333_v10 }
 0x108   : > { %v502_v16 = vadd.f32 %v501_v15, %v422_v13 }
 0x10a   : > { %1638 = vmatprep.subr.msk.mxu0 %vm341_vm0, %v502_v16 }
 0x10b   : > { %1639 = vmatpush1.msk.msra.mxu0 %vm341_vm0, %v500_v17 }
 0x144   : > { %536 = vxpose.xlu1.b32.start.end [1/1] (short) %v415_v19, 128 }
 0x183   : > { %v520_v20 = vpop.trf.xlu1 }
 0x184   : > { %1640 = vmatmul.mubr.msk.f32.vlgmr.msra.gmra.mxu0 %vm337_vm1, %v520_v20 }
 0x185   : > { %740 = vmatprep.mubr.f32.mxu0 %v2089_v0 }
 0x187   : > { %v521_v21 = vpop.trf.xlu1 }
 0x188   : > { %1641 = vmatmul.mubr.msk.f32.gmra.mxu0 %vm337_vm1, %v521_v21 }
 0x189   : > { %746 = vmatprep.mubr.f32.mxu0 %v2089_v0 }
 0x18b   : > { %v522_v22 = vpop.trf.xlu1 }
 0x18c   : > { %1642 = vmatmul.mubr.msk.f32.gmra.mxu0 %vm337_vm1, %v522_v22 }
 0x18d   : > { %752 = vmatprep.mubr.f32.mxu0 %v2089_v0 }
 0x18f   : > { %v523_v23 = vpop.trf.xlu1 }
 0x190   : > { %1643 = vmatmul.mubr.msk.f32.gmra.mxu0 %vm337_vm1, %v523_v23 }
 0x191   : > { %758 = vmatprep.mubr.f32.mxu0 %v2089_v0 }
 0x193   : > { %v524_v24 = vpop.trf.xlu1 }
 0x194   : > { %1644 = vmatmul.mubr.msk.f32.gmra.mxu0 %vm337_vm1, %v524_v24 }
 0x195   : > { %764 = vmatprep.mubr.f32.mxu0 %v2089_v0 }
 0x197   : > { %v525_v25 = vpop.trf.xlu1 }
 0x198   : > { %1645 = vmatmul.mubr.msk.f32.gmra.mxu0 %vm337_vm1, %v525_v25 }
 0x199   : > { %770 = vmatprep.mubr.f32.mxu0 %v2089_v0 }
 0x19b   : > { %v526_v26 = vpop.trf.xlu1 }
 0x19c   : > { %1646 = vmatmul.mubr.msk.f32.gmra.mxu0 %vm337_vm1, %v526_v26 }
 0x19d   : > { %776 = vmatprep.mubr.f32.mxu0 %v2089_v0 }
 0x19f   : > { %v527_v27 = vpop.trf.xlu1 }
 0x1a0   : > { %1647 = vmatmul.mubr.msk.f32.gmra.mxu0 %vm337_vm1, %v527_v27 }
 0x1a1   : > { %782 = vmatprep.mubr.f32.mxu0 %v2089_v0 }
 0x1a3   : > { %v528_v28 = vpop.trf.xlu1 }
 0x1a4   : > { %1648 = vmatmul.mubr.msk.f32.gmra.mxu0 %vm337_vm1, %v528_v28 }
 0x1a5   : > { %788 = vmatprep.mubr.f32.mxu0 %v2089_v0 }
 0x1a7   : > { %v529_v29 = vpop.trf.xlu1 }
 0x1a8   : > { %1649 = vmatmul.mubr.msk.f32.gmra.mxu0 %vm337_vm1, %v529_v29 }
 0x1a9   : > { %794 = vmatprep.mubr.f32.mxu0 %v2089_v0 }
 0x1ab   : > { %v530_v30 = vpop.trf.xlu1 }
 0x1ac   : > { %1650 = vmatmul.mubr.msk.f32.gmra.mxu0 %vm337_vm1, %v530_v30 }
 0x1ad   : > { %800 = vmatprep.mubr.f32.mxu0 %v2089_v0 }
 0x1af   : > { %v531_v31 = vpop.trf.xlu1 }
 0x1b0   : > { %1651 = vmatmul.mubr.msk.f32.gmra.mxu0 %vm337_vm1, %v531_v31 }
 0x1b1   : > { %806 = vmatprep.mubr.f32.mxu0 %v2089_v0 }
 0x1b3   : > { %v532_v32 = vpop.trf.xlu1 }
 0x1b4   : > { %1652 = vmatmul.mubr.msk.f32.gmra.mxu0 %vm337_vm1, %v532_v32 }
 0x1b5   : > { %812 = vmatprep.mubr.f32.mxu0 %v2089_v0 }
 0x1b7   : > { %v533_v33 = vpop.trf.xlu1 }
 0x1b8   : > { %1653 = vmatmul.mubr.msk.f32.gmra.mxu0 %vm337_vm1, %v533_v33 }
 0x1b9   : > { %818 = vmatprep.mubr.f32.mxu0 %v2089_v0 }
 0x1bb   : > { %v534_v34 = vpop.trf.xlu1 }
 0x1bc   : > { %1654 = vmatmul.mubr.msk.f32.gmra.mxu0 %vm337_vm1, %v534_v34 }
 0x1bd   : > { %824 = vmatprep.mubr.f32.mxu0 %v2089_v0 }
 0x1bf   : > { %v535_v35 = vpop.trf.xlu1 }
 0x1c0   : > { %1655 = vmatmul.mubr.msk.f32.gmra.mxu0 %vm337_vm1, %v535_v35 }
 0x1c1   : > { %830 = vmatprep.mubr.f32.mxu0 %v2089_v0 }
 0x1c3   : > { %v552_v36 = vpop.trf.xlu1 }
 0x1c4   : > { %1656 = vmatmul.mubr.msk.f32.gmra.mxu0 %vm337_vm1, %v552_v36 }
 0x1c5   : > { %836 = vmatprep.mubr.f32.mxu0 %v2089_v0 }
 0x1c7   : > { %v553_v37 = vpop.trf.xlu1 }
 0x1c8   : > { %1657 = vmatmul.mubr.msk.f32.gmra.mxu0 %vm337_vm1, %v553_v37 }
 0x1c9   : > { %842 = vmatprep.mubr.f32.mxu0 %v2089_v0 }
 0x1cb   : > { %v554_v38 = vpop.trf.xlu1 }
 0x1cc   : > { %1658 = vmatmul.mubr.msk.f32.gmra.mxu0 %vm337_vm1, %v554_v38 }
 0x1cd   : > { %848 = vmatprep.mubr.f32.mxu0 %v2089_v0 }
 0x1cf   : > { %v555_v39 = vpop.trf.xlu1 }
 0x1d0   : > { %1659 = vmatmul.mubr.msk.f32.gmra.mxu0 %vm337_vm1, %v555_v39 }
 0x1d1   : > { %854 = vmatprep.mubr.f32.mxu0 %v2089_v0 }
 0x1d3   : > { %v556_v40 = vpop.trf.xlu1 }
 0x1d4   : > { %1660 = vmatmul.mubr.msk.f32.gmra.mxu0 %vm337_vm1, %v556_v40 }
 0x1d5   : > { %860 = vmatprep.mubr.f32.mxu0 %v2089_v0 }
 0x1d7   : > { %v557_v41 = vpop.trf.xlu1 }
 0x1d8   : > { %1661 = vmatmul.mubr.msk.f32.gmra.mxu0 %vm337_vm1, %v557_v41 }
 0x1d9   : > { %866 = vmatprep.mubr.f32.mxu0 %v2089_v0 }
 0x1db   : > { %v558_v42 = vpop.trf.xlu1 }
 0x1dc   : > { %1662 = vmatmul.mubr.msk.f32.gmra.mxu0 %vm337_vm1, %v558_v42 }
 0x1dd   : > { %872 = vmatprep.mubr.f32.mxu0 %v2089_v0 }
 0x1df   : > { %v559_v43 = vpop.trf.xlu1 }
 0x1e0   : > { %1663 = vmatmul.mubr.msk.f32.gmra.mxu0 %vm337_vm1, %v559_v43 }
 0x1e1   : > { %878 = vmatprep.mubr.f32.mxu0 %v2089_v0 }
 0x1e3   : > { %v560_v44 = vpop.trf.xlu1 }
 0x1e4   : > { %1664 = vmatmul.mubr.msk.f32.gmra.mxu0 %vm337_vm1, %v560_v44 }
 0x1e5   : > { %884 = vmatprep.mubr.f32.mxu0 %v2089_v0 }
 0x1e7   : > { %v561_v45 = vpop.trf.xlu1 }
 0x1e8   : > { %1665 = vmatmul.mubr.msk.f32.gmra.mxu0 %vm337_vm1, %v561_v45 }
 0x1e9   : > { %890 = vmatprep.mubr.f32.mxu0 %v2089_v0 }
 0x1eb   : > { %v562_v46 = vpop.trf.xlu1 }
 0x1ec   : > { %1666 = vmatmul.mubr.msk.f32.gmra.mxu0 %vm337_vm1, %v562_v46 }
 0x1ed   : > { %896 = vmatprep.mubr.f32.mxu0 %v2089_v0 }
 0x1ef   : > { %v563_v47 = vpop.trf.xlu1 }
 0x1f0   : > { %1667 = vmatmul.mubr.msk.f32.gmra.mxu0 %vm337_vm1, %v563_v47 }
 0x1f1   : > { %902 = vmatprep.mubr.f32.mxu0 %v2089_v0 }
 0x1f3   : > { %v564_v48 = vpop.trf.xlu1 }
 0x1f4   : > { %1668 = vmatmul.mubr.msk.f32.gmra.mxu0 %vm337_vm1, %v564_v48 }
 0x1f5   : > { %908 = vmatprep.mubr.f32.mxu0 %v2089_v0 }
 0x1f7   : > { %v565_v49 = vpop.trf.xlu1 }
 0x1f8   : > { %1669 = vmatmul.mubr.msk.f32.gmra.mxu0 %vm337_vm1, %v565_v49 }
 0x1f9   : > { %914 = vmatprep.mubr.f32.mxu0 %v2089_v0 }
 0x1fb   : > { %v566_v50 = vpop.trf.xlu1 }
 0x1fc   : > { %1670 = vmatmul.mubr.msk.f32.gmra.mxu0 %vm337_vm1, %v566_v50 }
 0x1fd   : > { %920 = vmatprep.mubr.f32.mxu0 %v2089_v0 }
 0x1ff   : > { %v567_v51 = vpop.trf.xlu1 }
 0x200   : > { %1671 = vmatmul.mubr.msk.f32.gmra.mxu0 %vm337_vm1, %v567_v51 }
 0x244   : > { %v2340_v52 = vpop.f32.mrf.mxu0 }
 0x245   : > { %2756 = vst [vmem:[#allocation12_spill] sm:$0xff] %v2340_v52 }
 0x246   : > { %v2342_v53 = vpop.f32.mrf.mxu0 }
 0x247   : > { %2757 = vst [vmem:[#allocation13_spill] sm:$0xff] %v2342_v53 }
 0x248   : > { %v2344_v54 = vpop.f32.mrf.mxu0 }
 0x24a   : > { %v2346_v55 = vpop.f32.mrf.mxu0 }
 0x24b   : > { %2758 = vst [vmem:[#allocation14_spill] sm:$0xff] %v2346_v55 }
 0x24c   : > { %v2348_v56 = vpop.f32.mrf.mxu0 }
 0x24d   : > { %2759 = vst [vmem:[#allocation15_spill] sm:$0xff] %v2348_v56 }
 0x24e   : > { %v2350_v57 = vpop.f32.mrf.mxu0 }
 0x24f   : > { %2760 = vst [vmem:[#allocation16_spill] sm:$0xff] %v2350_v57 }
 0x250   : > { %v2352_v58 = vpop.f32.mrf.mxu0 }
 0x252   : > { %v2354_v59 = vpop.f32.mrf.mxu0 }
 0x254   : > { %v2356_v60 = vpop.f32.mrf.mxu0 }
 0x256   : > { %v2358_v61 = vpop.f32.mrf.mxu0 }
 0x257   : > { %v939_v51 = vmax.f32 %v2356_v60, %v2358_v61 }
 0x258   : > { %v2360_v62 = vpop.f32.mrf.mxu0 }
 0x25a   : > { %v2362_v63 = vpop.f32.mrf.mxu0 }
 0x25b   : > { %v942_v48 = vmax.f32 %v2360_v62, %v2362_v63 }
 0x25c   : > { %v2364_v0 = vpop.f32.mrf.mxu0 }
 0x25e   : > { %v2366_v1 = vpop.f32.mrf.mxu0 }
 0x25f   : > { %v945_v45 = vmax.f32 %v2364_v0, %v2366_v1 }
 0x260   : > { %v2368_v2 = vpop.f32.mrf.mxu0 }
 0x262   : > { %v2370_v3 = vpop.f32.mrf.mxu0 }
 0x263   : > { %v948_v4 = vmax.f32 %v2368_v2, %v2370_v3 }
 0x264   : > { %v2374_v5 = vpop.f32.mrf.mxu0 }
 0x265   : > { %949 = vmax.xlane.f32.xlu1 %v948_v4 }
 0x266   : > { %v2376_v6 = vpop.f32.mrf.mxu0 }
 0x267   : > { %v951_v42 = vmax.f32 %v2374_v5, %v2376_v6 }
 0x268   : > { %v2378_v7 = vpop.f32.mrf.mxu0 }
 0x26a   : > { %v2380_v8 = vpop.f32.mrf.mxu0 }
 0x26b   : > { %v954_v39 = vmax.f32 %v2378_v7, %v2380_v8 }
 0x26c   : > { %v2382_v9 = vpop.f32.mrf.mxu0 }
 0x26e   : > { %v2384_v10 = vpop.f32.mrf.mxu0 }
 0x26f   : > { %v957_v36 = vmax.f32 %v2382_v9, %v2384_v10 }
 0x270   : > { %v2386_v11 = vpop.f32.mrf.mxu0 }
 0x272   : > { %v2388_v12 = vpop.f32.mrf.mxu0 }
 0x273   : > { %v960_v33 = vmax.f32 %v2386_v11, %v2388_v12 }
 0x274   : > { %v2390_v13 = vpop.f32.mrf.mxu0 }
 0x276   : > { %v2392_v14 = vpop.f32.mrf.mxu0 }
 0x277   : > { %v963_v30 = vmax.f32 %v2390_v13, %v2392_v14 }
 0x278   : > { %v2394_v15 = vpop.f32.mrf.mxu0 }
 0x27a   : > { %v2396_v16 = vpop.f32.mrf.mxu0 }
 0x27b   : > { %v966_v27 = vmax.f32 %v2394_v15, %v2396_v16 }
 0x27c   : > { %v2398_v17 = vpop.f32.mrf.mxu0 }
 0x27e   : > { %v2400_v18 = vpop.f32.mrf.mxu0 }
 0x27f   : > { %v969_v24 = vmax.f32 %v2398_v17, %v2400_v18 }
 0x280   : > { %v2402_v19 = vpop.f32.mrf.mxu0 }
 0x282   : > { %v2404_v20 = vpop.f32.mrf.mxu0 }
 0x283   : > { %v972_v21 = vmax.f32 %v2402_v19, %v2404_v20 }
 0x284   : > { %v2408_v22 = vpop.f32.mrf.mxu0 }
 0x285   : > { %973 = vmax.xlane.f32.xlu0 %v972_v21 }
 0x286   : > { %v2410_v23 = vpop.f32.mrf.mxu0 }
 0x287   : > { %2761 = vst [vmem:[#allocation17_spill] sm:$0xff] %v2410_v23 }
 0x288   : > { %v2414_v25 = vpop.f32.mrf.mxu0 }
 0x289   : > { %2762 = vst [vmem:[#allocation18_spill] sm:$0xff] %v2414_v25  ;;  %970 = vmax.xlane.f32.xlu0 %v969_v24  ;;  %v936_v24 = vmax.f32 %v2352_v58, %v2354_v59 }
 0x28a   : > { %v2416_v26 = vpop.f32.mrf.mxu0 }
 0x28b   : > { %2763 = vst [vmem:[#allocation19_spill] sm:$0xff] %v2416_v26 }
 0x28c   : > { %v2420_v28 = vpop.f32.mrf.mxu0 }
 0x28d   : > { %967 = vmax.xlane.f32.xlu0 %v966_v27 }
 0x28e   : > { %v2422_v29 = vpop.f32.mrf.mxu0 }
 0x28f   : > { %2764 = vst [vmem:[#allocation20_spill] sm:$0xff] %v2422_v29 }
 0x290   : > { %v2426_v31 = vpop.f32.mrf.mxu0 }
 0x291   : > { %964 = vmax.xlane.f32.xlu0 %v963_v30 }
 0x292   : > { %v2428_v32 = vpop.f32.mrf.mxu0 }
 0x293   : > { %2765 = vst [vmem:[#allocation21_spill] sm:$0xff] %v2428_v32 }
 0x294   : > { %v2432_v34 = vpop.f32.mrf.mxu0 }
 0x295   : > { %2766 = vst [vmem:[#allocation22_spill] sm:$0xff] %v2432_v34  ;;  %961 = vmax.xlane.f32.xlu0 %v960_v33  ;;  %v933_v33 = vmax.f32 %v2348_v56, %v2350_v57 }
 0x296   : > { %v2434_v35 = vpop.f32.mrf.mxu0 }
 0x297   : > { %2767 = vst [vmem:[#allocation23_spill] sm:$0xff] %v2434_v35 }
 0x298   : > { %v2438_v37 = vpop.f32.mrf.mxu0 }
 0x299   : > { %958 = vmax.xlane.f32.xlu0 %v957_v36 }
 0x29a   : > { %v2440_v38 = vpop.f32.mrf.mxu0 }
 0x29c   : > { %v2444_v40 = vpop.f32.mrf.mxu0 }
 0x29d   : > { %955 = vmax.xlane.f32.xlu0 %v954_v39 }
 0x29e   : > { %v2446_v41 = vpop.f32.mrf.mxu0 }
 0x2a0   : > { %v2450_v43 = vpop.f32.mrf.mxu0 }
 0x2a1   : > { %952 = vmax.xlane.f32.xlu0 %v951_v42  ;;  %v930_v42 = vmax.f32 %v2344_v54, %v2346_v55 }
 0x2a2   : > { %v2452_v44 = vpop.f32.mrf.mxu0 }
 0x2a4   : > { %v2456_v46 = vpop.f32.mrf.mxu0 }
 0x2a5   : > { %946 = vmax.xlane.f32.xlu0 %v945_v45 }
 0x2a6   : > { %v2458_v47 = vpop.f32.mrf.mxu0 }
 0x2a8   : > { %v2462_v49 = vpop.f32.mrf.mxu0 }
 0x2a9   : > { %943 = vmax.xlane.f32.xlu0 %v942_v48 }
 0x2aa   : > { %v2464_v50 = vpop.f32.mrf.mxu0 }
 0x2ac   : > { %v2468_v4 = vpop.f32.mrf.mxu0 }
 0x2ad   : > { %940 = vmax.xlane.f32.xlu0 %v939_v51  ;;  %v927_v51 = vmax.f32 %v2340_v52, %v2342_v53 }
 0x2ae   : > { %v2470_v21 = vpop.f32.mrf.mxu0 }
 0x2b0   : > { %v2474_v27 = vpop.f32.mrf.mxu0 }
 0x2b1   : > { %937 = vmax.xlane.f32.xlu0 %v936_v24 }
 0x2b2   : > { %v2476_v30 = vpop.f32.mrf.mxu0 }
 0x2b3   : > { %v1008_v52 = vmax.f32 %v2474_v27, %v2476_v30 }
 0x2b4   : > { %v2480_v36 = vpop.f32.mrf.mxu0 }
 0x2b5   : > { %934 = vmax.xlane.f32.xlu0 %v933_v33 }
 0x2b6   : > { %v2482_v39 = vpop.f32.mrf.mxu0 }
 0x2b8   : > { %v2486_v45 = vpop.f32.mrf.mxu0 }
 0x2b9   : > { %931 = vmax.xlane.f32.xlu0 %v930_v42 }
 0x2ba   : > { %v2488_v48 = vpop.f32.mrf.mxu0 }
 0x2bb   : > { %v1014_v53 = vmax.f32 %v2486_v45, %v2488_v48 }
 0x2bc   : > { %v2492_v24 = vpop.f32.mrf.mxu0 }
 0x2bd   : > { %928 = vmax.xlane.f32.xlu0 %v927_v51  ;;  %v1011_v51 = vmax.f32 %v2480_v36, %v2482_v39 }
 0x2be   : > { %v2494_v56 = vpop.f32.mrf.mxu0 }
 0x2bf   : > { %v1017_v42 = vmax.f32 %v2492_v24, %v2494_v56 }
 0x2c0   : > { %v2496_v57 = vpop.f32.mrf.mxu0 }
 0x2c2   : > { %v2498_v33 = vpop.f32.mrf.mxu0 }
 0x2c3   : > { %2768 = vst [vmem:[#allocation24_spill] sm:$0xff] %v2498_v33  ;;  %v1020_v55 = vmax.f32 %v2496_v57, %v2498_v33  ;;  %v1005_v33 = vmax.f32 %v2468_v4, %v2470_v21 }
 0x2c5   : > { %1021 = vmax.xlane.f32.xlu0 %v1020_v55  ;;  %v1002_v55 = vmax.f32 %v2462_v49, %v2464_v50 }
 0x2c9   : > { %1018 = vmax.xlane.f32.xlu0 %v1017_v42  ;;  %v999_v42 = vmax.f32 %v2456_v46, %v2458_v47 }
 0x2cd   : > { %1015 = vmax.xlane.f32.xlu0 %v1014_v53  ;;  %v996_v53 = vmax.f32 %v2450_v43, %v2452_v44 }
 0x2d1   : > { %1012 = vmax.xlane.f32.xlu0 %v1011_v51  ;;  %v993_v51 = vmax.f32 %v2444_v40, %v2446_v41 }
 0x2d5   : > { %1009 = vmax.xlane.f32.xlu0 %v1008_v52  ;;  %v990_v52 = vmax.f32 %v2438_v37, %v2440_v38 }
 0x2d9   : > { %1006 = vmax.xlane.f32.xlu0 %v1005_v33  ;;  %v987_v33 = vmax.f32 %v2432_v34, %v2434_v35 }
 0x2dd   : > { %1003 = vmax.xlane.f32.xlu0 %v1002_v55  ;;  %v984_v55 = vmax.f32 %v2426_v31, %v2428_v32 }
 0x2e1   : > { %1000 = vmax.xlane.f32.xlu0 %v999_v42  ;;  %v981_v42 = vmax.f32 %v2420_v28, %v2422_v29 }
 0x2e5   : > { %997 = vmax.xlane.f32.xlu0 %v996_v53  ;;  %v978_v53 = vmax.f32 %v2414_v25, %v2416_v26 }
 0x2e9   : > { %994 = vmax.xlane.f32.xlu0 %v993_v51  ;;  %v975_v51 = vmax.f32 %v2408_v22, %v2410_v23 }
 0x2ed   : > { %991 = vmax.xlane.f32.xlu0 %v990_v52 }
 0x2f1   : > { %988 = vmax.xlane.f32.xlu0 %v987_v33 }
 0x2f5   : > { %985 = vmax.xlane.f32.xlu0 %v984_v55 }
 0x2f9   : > { %982 = vmax.xlane.f32.xlu0 %v981_v42 }
 0x2fd   : > { %979 = vmax.xlane.f32.xlu0 %v978_v53 }
 0x301   : > { %976 = vmax.xlane.f32.xlu0 %v975_v51 }
 0x30e   : > { %v974_v52 = vpop.xlane.xlu0 %973 }
 0x30f   : > { %v1053_v35 = vsub.f32 %v2402_v19, %v974_v52  ;;  %v1054_v33 = vsub.f32 %v2404_v20, %v974_v52 }
 0x311   : > { %v1147_v34 = vmul.f32 1.442695, %v1053_v35  ;;  %v1149_v32 = vmul.f32 1.442695, %v1054_v33 }
 0x312   : > { %v971_v55 = vpop.xlane.xlu0 %970 }
 0x313   : > { %1752 = vpow2.f32 %v1147_v34  ;;  %v1051_v29 = vsub.f32 %v2398_v17, %v971_v55  ;;  %v1052_v42 = vsub.f32 %v2400_v18, %v971_v55 }
 0x314   : > { %1754 = vpow2.f32 %v1149_v32 }
 0x315   : > { %v1143_v26 = vmul.f32 1.442695, %v1051_v29  ;;  %v1145_v53 = vmul.f32 1.442695, %v1052_v42 }
 0x316   : > { %v968_v25 = vpop.xlane.xlu0 %967 }
 0x317   : > { %1756 = vpow2.f32 %v1143_v26  ;;  %v1049_v51 = vsub.f32 %v2394_v15, %v968_v25  ;;  %v1050_v23 = vsub.f32 %v2396_v16, %v968_v25 }
 0x318   : > { %1758 = vpow2.f32 %v1145_v53 }
 0x319   : > { %v1139_v19 = vmul.f32 1.442695, %v1049_v51  ;;  %v1141_v20 = vmul.f32 1.442695, %v1050_v23 }
 0x31a   : > { %v965_v35 = vpop.xlane.xlu0 %964 }
 0x31b   : > { %1760 = vpow2.f32 %v1139_v19  ;;  %v1047_v34 = vsub.f32 %v2390_v13, %v965_v35  ;;  %v1048_v17 = vsub.f32 %v2392_v14, %v965_v35 }
 0x31c   : > { %1762 = vpow2.f32 %v1141_v20  ;;  %v950_v20 = vpop.xlane.xlu1 %949 }
 0x31d   : > { %v1135_v18 = vmul.f32 1.442695, %v1047_v34  ;;  %v1137_v32 = vmul.f32 1.442695, %v1048_v17 }
 0x31e   : > { %v962_v29 = vpop.xlane.xlu0 %961 }
 0x31f   : > { %1764 = vpow2.f32 %v1135_v18  ;;  %v1045_v26 = vsub.f32 %v2386_v11, %v962_v29  ;;  %v1046_v15 = vsub.f32 %v2388_v12, %v962_v29 }
 0x320   : > { %v1753_v52 = vpop.eup %1752  ;;  %1766 = vpow2.f32 %v1137_v32  ;;  %v1038_v32 = vsub.f32 %v2370_v3, %v950_v20 }
 0x321   : > { %v1755_v16 = vpop.eup %1754  ;;  %v1131_v25 = vmul.f32 1.442695, %v1045_v26  ;;  %v1133_v23 = vmul.f32 1.442695, %v1046_v15 }
 0x322   : > { %1312 = vmatprep.subr.mxu1 %v1755_v16  ;;  %v959_v33 = vpop.xlane.xlu0 %958  ;;  %v2542_v55 = vadd.f32 %v1755_v16, %v1753_v52  ;;  %v1037_v16 = vsub.f32 %v2368_v2, %v950_v20 }
 0x323   : > { %1768 = vpow2.f32 %v1131_v25  ;;  %1313 = vmatpush1.xpose.msra.mxu1 %v1753_v52  ;;  %v1043_v13 = vsub.f32 %v2382_v9, %v959_v33  ;;  %v1044_v14 = vsub.f32 %v2384_v10, %v959_v33  ;;  %v1117_v33 = vmul.f32 1.442695, %v1038_v32 }
 0x324   : > { %v1757_v42 = vpop.eup %1756  ;;  %1770 = vpow2.f32 %v1133_v23 }
 0x325   : > { %v1759_v11 = vpop.eup %1758  ;;  %v1127_v53 = vmul.f32 1.442695, %v1043_v13  ;;  %v1129_v12 = vmul.f32 1.442695, %v1044_v14 }
 0x326   : > { %1314 = vmatprep.subr.mxu1 %v1759_v11  ;;  %v956_v51 = vpop.xlane.xlu0 %955  ;;  %v2546_v19 = vadd.f32 %v1759_v11, %v1757_v42 }
 0x327   : > { %1772 = vpow2.f32 %v1127_v53  ;;  %1315 = vmatpush1.xpose.msra.mxu1 %v1757_v42  ;;  %v1041_v35 = vsub.f32 %v2378_v7, %v956_v51  ;;  %v1042_v34 = vsub.f32 %v2380_v8, %v956_v51 }
 0x328   : > { %v1761_v17 = vpop.eup %1760  ;;  %1774 = vpow2.f32 %v1129_v12 }
 0x329   : > { %v1763_v9 = vpop.eup %1762  ;;  %v1123_v10 = vmul.f32 1.442695, %v1041_v35  ;;  %v1125_v18 = vmul.f32 1.442695, %v1042_v34 }
 0x32a   : > { %1316 = vmatprep.subr.mxu1 %v1763_v9  ;;  %v953_v29 = vpop.xlane.xlu0 %952  ;;  %v2551_v26 = vadd.f32 %v1763_v9, %v1761_v17 }
 0x32b   : > { %1776 = vpow2.f32 %v1123_v10  ;;  %1317 = vmatpush1.xpose.msra.mxu1 %v1761_v17  ;;  %v1039_v15 = vsub.f32 %v2374_v5, %v953_v29  ;;  %v1040_v52 = vsub.f32 %v2376_v6, %v953_v29  ;;  %v1115_v6 = vmul.f32 1.442695, %v1037_v16 }
 0x32c   : > { %v1765_v7 = vpop.eup %1764  ;;  %1778 = vpow2.f32 %v1125_v18 }
 0x32d   : > { %v1767_v8 = vpop.eup %1766  ;;  %v1119_v25 = vmul.f32 1.442695, %v1039_v15  ;;  %v1121_v23 = vmul.f32 1.442695, %v1040_v52 }
 0x32e   : > { %1318 = vmatprep.subr.mxu1 %v1767_v8  ;;  %v947_v3 = vpop.xlane.xlu0 %946  ;;  %v2556_v13 = vadd.f32 %v1767_v8, %v1765_v7 }
 0x32f   : > { %1780 = vpow2.f32 %v1119_v25  ;;  %1319 = vmatpush1.xpose.msra.mxu1 %v1765_v7  ;;  %v1036_v14 = vsub.f32 %v2366_v1, %v947_v3  ;;  %v1035_v11 = vsub.f32 %v2364_v0, %v947_v3 }
 0x330   : > { %v1769_v42 = vpop.eup %1768  ;;  %1782 = vpow2.f32 %v1121_v23 }
 0x331   : > { %v1771_v5 = vpop.eup %1770  ;;  %1784 = vpow2.f32 %v1117_v33  ;;  %v1113_v53 = vmul.f32 1.442695, %v1036_v14  ;;  %v1111_v34 = vmul.f32 1.442695, %v1035_v11  ;;  %v2769_v14 = vld [vmem:[#allocation16_spill] sm:$0xff] }
 0x332   : > { %1320 = vmatprep.subr.mxu1 %v1771_v5  ;;  %v944_v2 = vpop.xlane.xlu0 %943  ;;  %v2560_v12 = vadd.f32 %v1771_v5, %v1769_v42  ;;  %1786 = vpow2.f32 %v1115_v6  ;;  %v2770_v5 = vld [vmem:[#allocation15_spill] sm:$0xff] }
 0x333   : > { %1321 = vmatpush1.xpose.msra.mxu1 %v1769_v42  ;;  %v1034_v51 = vsub.f32 %v2362_v63, %v944_v2  ;;  %v1033_v1 = vsub.f32 %v2360_v62, %v944_v2  ;;  %1788 = vpow2.f32 %v1113_v53 }
 0x334   : > { %v1773_v20 = vpop.eup %1772  ;;  %1790 = vpow2.f32 %v1111_v34 }
 0x335   : > { %v1775_v35 = vpop.eup %1774  ;;  %v1109_v17 = vmul.f32 1.442695, %v1034_v51  ;;  %v1107_v29 = vmul.f32 1.442695, %v1033_v1 }
 0x336   : > { %1322 = vmatprep.subr.mxu1 %v1775_v35  ;;  %v941_v9 = vpop.xlane.xlu0 %940  ;;  %v2564_v0 = vadd.f32 %v1775_v35, %v1773_v20 }
 0x337   : > { %1323 = vmatpush1.xpose.msra.mxu1 %v1773_v20  ;;  %v1032_v10 = vsub.f32 %v2358_v61, %v941_v9  ;;  %v1031_v63 = vsub.f32 %v2356_v60, %v941_v9  ;;  %1792 = vpow2.f32 %v1109_v17  ;;  %v2771_v20 = vld [vmem:[#allocation14_spill] sm:$0xff] }
 0x338   : > { %v1777_v18 = vpop.eup %1776  ;;  %1794 = vpow2.f32 %v1107_v29 }
 0x339   : > { %v1779_v32 = vpop.eup %1778  ;;  %v1105_v15 = vmul.f32 1.442695, %v1032_v10  ;;  %v1103_v25 = vmul.f32 1.442695, %v1031_v63 }
 0x33a   : > { %1324 = vmatprep.subr.mxu1 %v1779_v32  ;;  %v938_v52 = vpop.xlane.xlu0 %937  ;;  %v2568_v62 = vadd.f32 %v1779_v32, %v1777_v18  ;;  %v2772_v32 = vld [vmem:[#allocation12_spill] sm:$0xff] }
 0x33b   : > { %1325 = vmatpush1.xpose.msra.mxu1 %v1777_v18  ;;  %v1030_v7 = vsub.f32 %v2354_v59, %v938_v52  ;;  %v1029_v61 = vsub.f32 %v2352_v58, %v938_v52  ;;  %1796 = vpow2.f32 %v1105_v15 }
 0x33c   : > { %v1781_v8 = vpop.eup %1780  ;;  %1798 = vpow2.f32 %v1103_v25 }
 0x33d   : > { %v1783_v16 = vpop.eup %1782  ;;  %v1101_v23 = vmul.f32 1.442695, %v1030_v7  ;;  %v1099_v59 = vmul.f32 1.442695, %v1029_v61 }
 0x33e   : > { %1326 = vmatprep.subr.mxu1 %v1783_v16  ;;  %v935_v33 = vpop.xlane.xlu0 %934  ;;  %v2572_v60 = vadd.f32 %v1783_v16, %v1781_v8  ;;  %v2574_v3 = vpop.eup %1784 }
 0x33f   : > { %1327 = vmatpush1.xpose.msra.mxu1 %v1781_v8  ;;  %v1028_v42 = vsub.f32 %v2769_v14, %v935_v33  ;;  %v1027_v6 = vsub.f32 %v2770_v5, %v935_v33  ;;  %v2579_v11 = vpop.eup %1786  ;;  %1800 = vpow2.f32 %v1101_v23  ;;  %v2774_v33 = vld [vmem:[#allocation24_spill] sm:$0xff] }
 0x340   : > { %1328 = vmatprep.subr.mxu1 %v2574_v3  ;;  %v2581_v2 = vpop.eup %1788  ;;  %1802 = vpow2.f32 %v1099_v59 }
 0x341   : > { %v1097_v58 = vmul.f32 1.442695, %v1028_v42  ;;  %v1095_v34 = vmul.f32 1.442695, %v1027_v6  ;;  %v2587_v9 = vpop.eup %1790 }
 0x342   : > { %v932_v53 = vpop.xlane.xlu0 %931 }
 0x343   : > { %v1025_v51 = vsub.f32 %v2344_v54, %v932_v53  ;;  %v1026_v35 = vsub.f32 %v2771_v20, %v932_v53  ;;  %1329 = vmatpush1.xpose.msra.mxu1 %v2579_v11  ;;  %1804 = vpow2.f32 %v1097_v58  ;;  %v2773_v54 = vld [vmem:[#allocation13_spill] sm:$0xff] }
 0x344   : > { %1330 = vmatprep.subr.mxu1 %v2581_v2  ;;  %v2589_v18 = vpop.eup %1792 }
 0x345   : > { %v1091_v1 = vmul.f32 1.442695, %v1025_v51  ;;  %v1093_v17 = vmul.f32 1.442695, %v1026_v35  ;;  %v2595_v7 = vpop.eup %1794 }
 0x346   : > { %v929_v10 = vpop.xlane.xlu0 %928 }
 0x347   : > { %1806 = vpow2.f32 %v1091_v1  ;;  %v1023_v29 = vsub.f32 %v2772_v32, %v929_v10  ;;  %v1024_v63 = vsub.f32 %v2773_v54, %v929_v10  ;;  %1331 = vmatpush1.xpose.msra.mxu1 %v2587_v9 }
 0x348   : > { %1808 = vpow2.f32 %v1093_v17  ;;  %1332 = vmatprep.subr.mxu1 %v2589_v18  ;;  %v2597_v8 = vpop.eup %1796 }
 0x349   : > { %1810 = vpow2.f32 %v1095_v34  ;;  %v1087_v15 = vmul.f32 1.442695, %v1023_v29  ;;  %v1089_v52 = vmul.f32 1.442695, %v1024_v63  ;;  %v2601_v16 = vpop.eup %1798 }
 0x34b   : > { %1812 = vpow2.f32 %v1087_v15  ;;  %1333 = vmatpush1.xpose.msra.mxu1 %v2595_v7 }
 0x34c   : > { %1814 = vpow2.f32 %v1089_v52  ;;  %1334 = vmatprep.subr.mxu1 %v2597_v8  ;;  %v1801_v61 = vpop.eup %1800 }
 0x34d   : > { %v1803_v5 = vpop.eup %1802 }
 0x34e   : > { %v1022_v25 = vpop.xlane.xlu0 %1021 }
 0x34f   : > { %v1085_v23 = vsub.f32 %v2496_v57, %v1022_v25  ;;  %v1086_v14 = vsub.f32 %v2774_v33, %v1022_v25  ;;  %1335 = vmatpush1.xpose.msra.mxu1 %v2601_v16 }
 0x350   : > { %1336 = vmatprep.subr.mxu1 %v1801_v61  ;;  %v1805_v58 = vpop.eup %1804 }
 0x351   : > { %v1211_v42 = vmul.f32 1.442695, %v1085_v23  ;;  %v1213_v59 = vmul.f32 1.442695, %v1086_v14 }
 0x352   : > { %v1019_v6 = vpop.xlane.xlu0 %1018 }
 0x353   : > { %1816 = vpow2.f32 %v1211_v42  ;;  %v1083_v53 = vsub.f32 %v2492_v24, %v1019_v6  ;;  %v1084_v51 = vsub.f32 %v2494_v56, %v1019_v6  ;;  %1337 = vmatpush1.xpose.msra.mxu1 %v1803_v5  ;;  %v1224_v42 = vadd.f32 %v1803_v5, %v1801_v61 }
 0x354   : > { %v1807_v20 = vpop.eup %1806  ;;  %1818 = vpow2.f32 %v1213_v59  ;;  %1338 = vmatprep.subr.mxu1 %v1805_v58 }
 0x355   : > { %v1809_v57 = vpop.eup %1808  ;;  %v1207_v35 = vmul.f32 1.442695, %v1083_v53  ;;  %v1209_v34 = vmul.f32 1.442695, %v1084_v51 }
 0x356   : > { %v1811_v1 = vpop.eup %1810  ;;  %v1016_v17 = vpop.xlane.xlu0 %1015  ;;  %v1218_v10 = vadd.f32 %v1809_v57, %v1807_v20 }
 0x357   : > { %1820 = vpow2.f32 %v1207_v35  ;;  %v1081_v32 = vsub.f32 %v2486_v45, %v1016_v17  ;;  %v1082_v29 = vsub.f32 %v2488_v48, %v1016_v17  ;;  %1339 = vmatpush1.xpose.msra.mxu1 %v1811_v1  ;;  %v1221_v52 = vadd.f32 %v1811_v1, %v1805_v58 }
 0x358   : > { %v1813_v54 = vpop.eup %1812  ;;  %1822 = vpow2.f32 %v1209_v34  ;;  %1219 = vadd.xlane.f32.xlu1 %v1218_v10  ;;  %1340 = vmatprep.subr.mxu1 %v1809_v57  ;;  %v1230_v17 = vadd.f32 %v2595_v7, %v2589_v18 }
 0x359   : > { %v1815_v56 = vpop.eup %1814  ;;  %v1203_v24 = vmul.f32 1.442695, %v1081_v32  ;;  %v1205_v63 = vmul.f32 1.442695, %v1082_v29 }
 0x35a   : > { %v1013_v15 = vpop.xlane.xlu0 %1012  ;;  %v1215_v25 = vadd.f32 %v1815_v56, %v1813_v54 }
 0x35b   : > { %1824 = vpow2.f32 %v1203_v24  ;;  %v1079_v23 = vsub.f32 %v2480_v36, %v1013_v15  ;;  %v1080_v33 = vsub.f32 %v2482_v39, %v1013_v15  ;;  %1341 = vmatpush1.xpose.msra.mxu1 %v1807_v20  ;;  %v1227_v20 = vadd.f32 %v2601_v16, %v2597_v8 }
 0x35c   : > { %1826 = vpow2.f32 %v1205_v63  ;;  %1222 = vadd.xlane.f32.xlu1 %v1221_v52  ;;  %1216 = vadd.xlane.f32.xlu0 %v1215_v25  ;;  %v1236_v25 = vadd.f32 %v2579_v11, %v2574_v3 }
 0x35d   : > { %v1199_v45 = vmul.f32 1.442695, %v1079_v23  ;;  %v1201_v48 = vmul.f32 1.442695, %v1080_v33  ;;  %1342 = vmatprep.subr.mxu1 %v1815_v56  ;;  %v1233_v56 = vadd.f32 %v2587_v9, %v2581_v2 }
 0x35e   : > { %v1010_v14 = vpop.xlane.xlu0 %1009 }
 0x35f   : > { %1828 = vpow2.f32 %v1199_v45  ;;  %v1077_v59 = vsub.f32 %v2474_v27, %v1010_v14  ;;  %v1078_v6 = vsub.f32 %v2476_v30, %v1010_v14  ;;  %1343 = vmatpush1.xpose.msra.mxu1 %v1813_v54 }
 0x360   : > { %v1817_v58 = vpop.eup %1816  ;;  %1830 = vpow2.f32 %v1201_v48  ;;  %1225 = vadd.xlane.f32.xlu1 %v1224_v42 }
 0x361   : > { %v1819_v36 = vpop.eup %1818  ;;  %v1195_v39 = vmul.f32 1.442695, %v1077_v59  ;;  %v1197_v53 = vmul.f32 1.442695, %v1078_v6 }
 0x362   : > { %1344 = vmatprep.subr.mxu1 %v1819_v36  ;;  %v1007_v51 = vpop.xlane.xlu0 %1006  ;;  %v2616_v57 = vadd.f32 %v1819_v36, %v1817_v58 }
 0x363   : > { %1832 = vpow2.f32 %v1195_v39  ;;  %v1075_v61 = vsub.f32 %v2468_v4, %v1007_v51  ;;  %v1076_v27 = vsub.f32 %v2470_v21, %v1007_v51  ;;  %1345 = vmatpush2.xpose.msra.mxu1 %v1817_v58 }
 0x364   : > { %v1821_v30 = vpop.eup %1820  ;;  %1834 = vpow2.f32 %v1197_v53  ;;  %1228 = vadd.xlane.f32.xlu1 %v1227_v20 }
 0x365   : > { %v1823_v5 = vpop.eup %1822  ;;  %v1191_v35 = vmul.f32 1.442695, %v1075_v61  ;;  %v1193_v34 = vmul.f32 1.442695, %v1076_v27  ;;  %v2775_v61 = vld [vmem:[#allocation22_spill] sm:$0xff] }
 0x366   : > { %1346 = vmatprep.subr.mxu1 %v1823_v5  ;;  %v1004_v1 = vpop.xlane.xlu0 %1003  ;;  %v2622_v8 = vadd.f32 %v1823_v5, %v1821_v30 }
 0x367   : > { %1836 = vpow2.f32 %v1191_v35  ;;  %v1073_v16 = vsub.f32 %v2462_v49, %v1004_v1  ;;  %v1074_v4 = vsub.f32 %v2464_v50, %v1004_v1  ;;  %1347 = vmatpush2.xpose.msra.mxu1 %v1821_v30  ;;  %v2776_v30 = vld [vmem:[#allocation23_spill] sm:$0xff] }
 0x368   : > { %v1825_v21 = vpop.eup %1824  ;;  %1838 = vpow2.f32 %v1193_v34  ;;  %1231 = vadd.xlane.f32.xlu1 %v1230_v17 }
 0x369   : > { %v1827_v10 = vpop.eup %1826  ;;  %v1187_v32 = vmul.f32 1.442695, %v1073_v16  ;;  %v1189_v29 = vmul.f32 1.442695, %v1074_v4  ;;  %v2777_v16 = vld [vmem:[#allocation21_spill] sm:$0xff] }
 0x36a   : > { %1348 = vmatprep.subr.mxu1 %v1827_v10  ;;  %v1001_v54 = vpop.xlane.xlu0 %1000  ;;  %v2628_v18 = vadd.f32 %v1827_v10, %v1825_v21 }
 0x36b   : > { %1840 = vpow2.f32 %v1187_v32  ;;  %v1071_v7 = vsub.f32 %v2456_v46, %v1001_v54  ;;  %v1072_v49 = vsub.f32 %v2458_v47, %v1001_v54  ;;  %1349 = vmatpush2.xpose.msra.mxu1 %v1825_v21 }
 0x36c   : > { %v1829_v50 = vpop.eup %1828  ;;  %1842 = vpow2.f32 %v1189_v29  ;;  %1234 = vadd.xlane.f32.xlu1 %v1233_v56 }
 0x36d   : > { %v1831_v24 = vpop.eup %1830  ;;  %v1183_v63 = vmul.f32 1.442695, %v1071_v7  ;;  %v1185_v15 = vmul.f32 1.442695, %v1072_v49  ;;  %v2778_v7 = vld [vmem:[#allocation20_spill] sm:$0xff] }
 0x36e   : > { %1350 = vmatprep.subr.mxu1 %v1831_v24  ;;  %v998_v52 = vpop.xlane.xlu0 %997  ;;  %v2634_v2 = vadd.f32 %v1831_v24, %v1829_v50 }
 0x36f   : > { %1844 = vpow2.f32 %v1183_v63  ;;  %v1069_v9 = vsub.f32 %v2450_v43, %v998_v52  ;;  %v1070_v46 = vsub.f32 %v2452_v44, %v998_v52  ;;  %1351 = vmatpush2.xpose.msra.mxu1 %v1829_v50 }
 0x370   : > { %v1833_v47 = vpop.eup %1832  ;;  %1846 = vpow2.f32 %v1185_v15  ;;  %1237 = vadd.xlane.f32.xlu1 %v1236_v25  ;;  %v2779_v15 = vld [vmem:[#allocation18_spill] sm:$0xff]  ;;  %v2780_v25 = vld [vmem:[#allocation19_spill] sm:$0xff] }
 0x371   : > { %v1835_v23 = vpop.eup %1834  ;;  %v1179_v33 = vmul.f32 1.442695, %v1069_v9  ;;  %v1181_v45 = vmul.f32 1.442695, %v1070_v46 }
 0x372   : > { %1352 = vmatprep.subr.mxu1 %v1835_v23  ;;  %v995_v48 = vpop.xlane.xlu0 %994  ;;  %v2638_v14 = vadd.f32 %v1835_v23, %v1833_v47 }
 0x373   : > { %1848 = vpow2.f32 %v1179_v33  ;;  %v1067_v3 = vsub.f32 %v2444_v40, %v995_v48  ;;  %v1068_v11 = vsub.f32 %v2446_v41, %v995_v48  ;;  %1353 = vmatpush2.xpose.msra.mxu1 %v1833_v47 }
 0x374   : > { %v1837_v43 = vpop.eup %1836  ;;  %1850 = vpow2.f32 %v1181_v45  ;;  %1240 = vadd.xlane.f32.xlu1 %v2572_v60  ;;  %v2781_v45 = vld [vmem:[#allocation17_spill] sm:$0xff] }
 0x375   : > { %v1839_v44 = vpop.eup %1838  ;;  %v1175_v42 = vmul.f32 1.442695, %v1067_v3  ;;  %v1177_v59 = vmul.f32 1.442695, %v1068_v11 }
 0x376   : > { %1354 = vmatprep.subr.mxu1 %v1839_v44  ;;  %v992_v6 = vpop.xlane.xlu0 %991  ;;  %v2643_v58 = vadd.f32 %v1839_v44, %v1837_v43 }
 0x377   : > { %1852 = vpow2.f32 %v1175_v42  ;;  %v1065_v36 = vsub.f32 %v2438_v37, %v992_v6  ;;  %v1066_v39 = vsub.f32 %v2440_v38, %v992_v6  ;;  %1355 = vmatpush2.xpose.msra.mxu1 %v1837_v43 }
 0x378   : > { %v1841_v40 = vpop.eup %1840  ;;  %1854 = vpow2.f32 %v1177_v59  ;;  %1243 = vadd.xlane.f32.xlu1 %v2568_v62 }
 0x379   : > { %v1843_v41 = vpop.eup %1842  ;;  %v1171_v53 = vmul.f32 1.442695, %v1065_v36  ;;  %v1173_v60 = vmul.f32 1.442695, %v1066_v39 }
 0x37a   : > { %1356 = vmatprep.subr.mxu1 %v1843_v41  ;;  %v989_v51 = vpop.xlane.xlu0 %988  ;;  %v2648_v20 = vadd.f32 %v1843_v41, %v1841_v40 }
 0x37b   : > { %1856 = vpow2.f32 %v1171_v53  ;;  %v1063_v27 = vsub.f32 %v2775_v61, %v989_v51  ;;  %v1064_v5 = vsub.f32 %v2776_v30, %v989_v51  ;;  %1357 = vmatpush2.xpose.msra.mxu1 %v1841_v40 }
 0x37c   : > { %v1845_v37 = vpop.eup %1844  ;;  %1858 = vpow2.f32 %v1173_v60  ;;  %1246 = vadd.xlane.f32.xlu1 %v2564_v0 }
 0x37d   : > { %v1847_v38 = vpop.eup %1846  ;;  %v1167_v35 = vmul.f32 1.442695, %v1063_v27  ;;  %v1169_v62 = vmul.f32 1.442695, %v1064_v5 }
 0x37e   : > { %1358 = vmatprep.subr.mxu1 %v1847_v38  ;;  %v986_v34 = vpop.xlane.xlu0 %985  ;;  %v2653_v1 = vadd.f32 %v1847_v38, %v1845_v37 }
 0x37f   : > { %1860 = vpow2.f32 %v1167_v35  ;;  %v1061_v17 = vsub.f32 %v2426_v31, %v986_v34  ;;  %v1062_v4 = vsub.f32 %v2777_v16, %v986_v34  ;;  %1359 = vmatpush2.xpose.msra.mxu1 %v1845_v37 }
 0x380   : > { %v1849_v21 = vpop.eup %1848  ;;  %1862 = vpow2.f32 %v1169_v62  ;;  %1249 = vadd.xlane.f32.xlu1 %v2560_v12 }
 0x381   : > { %v1851_v10 = vpop.eup %1850  ;;  %v1163_v32 = vmul.f32 1.442695, %v1061_v17  ;;  %v1165_v0 = vmul.f32 1.442695, %v1062_v4 }
 0x382   : > { %1360 = vmatprep.subr.mxu1 %v1851_v10  ;;  %v983_v29 = vpop.xlane.xlu0 %982  ;;  %v2658_v54 = vadd.f32 %v1851_v10, %v1849_v21 }
 0x383   : > { %1864 = vpow2.f32 %v1163_v32  ;;  %v1059_v56 = vsub.f32 %v2420_v28, %v983_v29  ;;  %v1060_v49 = vsub.f32 %v2778_v7, %v983_v29  ;;  %1361 = vmatpush2.xpose.msra.mxu1 %v1849_v21 }
 0x384   : > { %v2662_v31 = vpop.eup %1852  ;;  %1866 = vpow2.f32 %v1165_v0  ;;  %1252 = vadd.xlane.f32.xlu1 %v2556_v13 }
 0x385   : > { %v1855_v50 = vpop.eup %1854  ;;  %v1159_v12 = vmul.f32 1.442695, %v1059_v56  ;;  %v1161_v24 = vmul.f32 1.442695, %v1060_v49 }
 0x386   : > { %1362 = vmatprep.subr.mxu1 %v1855_v50  ;;  %v980_v63 = vpop.xlane.xlu0 %979  ;;  %v1281_v27 = vadd.f32 %v1855_v50, %v2662_v31 }
 0x387   : > { %1868 = vpow2.f32 %v1159_v12  ;;  %v1057_v52 = vsub.f32 %v2779_v15, %v980_v63  ;;  %v1058_v9 = vsub.f32 %v2780_v25, %v980_v63  ;;  %1363 = vmatpush2.xpose.msra.mxu1 %v2662_v31 }
 0x388   : > { %v1857_v28 = vpop.eup %1856  ;;  %1870 = vpow2.f32 %v1161_v24  ;;  %1255 = vadd.xlane.f32.xlu1 %v2551_v26 }
 0x389   : > { %v1859_v46 = vpop.eup %1858  ;;  %v1155_v47 = vmul.f32 1.442695, %v1057_v52  ;;  %v1157_v23 = vmul.f32 1.442695, %v1058_v9 }
 0x38a   : > { %1364 = vmatprep.subr.mxu1 %v1859_v46  ;;  %v977_v13 = vpop.xlane.xlu0 %976  ;;  %v1278_v61 = vadd.f32 %v1859_v46, %v1857_v28 }
 0x38b   : > { %1872 = vpow2.f32 %v1155_v47  ;;  %v1055_v33 = vsub.f32 %v2408_v22, %v977_v13  ;;  %v1056_v48 = vsub.f32 %v2781_v45, %v977_v13  ;;  %1365 = vmatpush2.xpose.msra.mxu1 %v1857_v28 }
 0x38c   : > { %v1861_v3 = vpop.eup %1860  ;;  %1874 = vpow2.f32 %v1157_v23  ;;  %1258 = vadd.xlane.f32.xlu1 %v2546_v19 }
 0x38d   : > { %v1863_v11 = vpop.eup %1862  ;;  %v1151_v43 = vmul.f32 1.442695, %v1055_v33  ;;  %v1153_v44 = vmul.f32 1.442695, %v1056_v48 }
 0x38e   : > { %1366 = vmatprep.subr.mxu1 %v1863_v11  ;;  %v1275_v51 = vadd.f32 %v1863_v11, %v1861_v3 }
 0x38f   : > { %1876 = vpow2.f32 %v1151_v43  ;;  %1367 = vmatpush2.xpose.msra.mxu1 %v1861_v3 }
 0x390   : > { %v1865_v26 = vpop.eup %1864  ;;  %1878 = vpow2.f32 %v1153_v44  ;;  %1261 = vadd.xlane.f32.xlu1 %v2542_v55  ;;  %v1944_v55 = vld [vmem:[%s290_s27] sm:$0xff]  ;;  %s1509_s27 = scalar_lea.hbm %s2732_s6, %s1679_s20 }
 0x391   : > { %v1867_v42 = vpop.eup %1866 }
 0x392   : > { %1368 = vmatprep.subr.mxu1 %v1867_v42  ;;  %v1272_v60 = vadd.f32 %v1867_v42, %v1865_v26 }
 0x393   : > { %1369 = vmatpush2.xpose.msra.mxu1 %v1865_v26 }
 0x394   : > { %v1869_v22 = vpop.eup %1868 }
 0x395   : > { %v1871_v59 = vpop.eup %1870 }
 0x396   : > { %1370 = vmatprep.subr.mxu1 %v1871_v59  ;;  %v1269_v53 = vadd.f32 %v1871_v59, %v1869_v22 }
 0x397   : > { %1371 = vmatpush2.xpose.msra.mxu1 %v1869_v22 }
 0x398   : > { %v1873_v6 = vpop.eup %1872 }
 0x399   : > { %v1875_v19 = vpop.eup %1874 }
 0x39a   : > { %1372 = vmatprep.subr.mxu1 %v1875_v19  ;;  %v1266_v41 = vadd.f32 %v1875_v19, %v1873_v6 }
 0x39b   : > { %1373 = vmatpush2.xpose.msra.mxu1 %v1873_v6 }
 0x39c   : > { %v1877_v36 = vpop.eup %1876 }
 0x39d   : > { %v1879_v39 = vpop.eup %1878 }
 0x39e   : > { %1374 = vmatprep.subr.mxu1 %v1879_v39  ;;  %v1263_v40 = vadd.f32 %v1879_v39, %v1877_v36 }
 0x39f   : > { %1375 = vmatpush2.xpose.msra.mxu1 %v1877_v36 }
 0x3a0   : > { %1264 = vadd.xlane.f32.xlu0 %v1263_v40 }
 0x3a2   : > { %1377 = vmatmul.mubr.f32.vlgmr.msra.gmra.mxu1 %v1944_v55 }
 0x3a4   : > { %1267 = vadd.xlane.f32.xlu0 %v1266_v41 }
 0x3a8   : > { %1270 = vadd.xlane.f32.xlu0 %v1269_v53 }
 0x3ac   : > { %1273 = vadd.xlane.f32.xlu0 %v1272_v60 }
 0x3b0   : > { %1276 = vadd.xlane.f32.xlu0 %v1275_v51 }
 0x3b4   : > { %1279 = vadd.xlane.f32.xlu0 %v1278_v61 }
 0x3b8   : > { %1282 = vadd.xlane.f32.xlu0 %v1281_v27 }
 0x3bc   : > { %1285 = vadd.xlane.f32.xlu0 %v2658_v54 }
 0x3c0   : > { %1288 = vadd.xlane.f32.xlu0 %v2653_v1 }
 0x3c4   : > { %1291 = vadd.xlane.f32.xlu0 %v2648_v20 }
 0x3c8   : > { %1294 = vadd.xlane.f32.xlu0 %v2643_v58 }
 0x3cc   : > { %1297 = vadd.xlane.f32.xlu0 %v2638_v14 }
 0x3d0   : > { %1300 = vadd.xlane.f32.xlu0 %v2634_v2 }
 0x3d4   : > { %1303 = vadd.xlane.f32.xlu0 %v2628_v18 }
 0x3d8   : > { %1306 = vadd.xlane.f32.xlu0 %v2622_v8 }
 0x3dc   : > { %1309 = vadd.xlane.f32.xlu0 %v2616_v57 }
 0x3e1   : > { %v1220_v30 = vpop.xlane.xlu1 %1219 }
 0x3e5   : > { %v1217_v5 = vpop.xlane.xlu0 %1216  ;;  %v1223_v37 = vpop.xlane.xlu1 %1222 }
 0x3e6   : > { %1880 = vrcp.f32 %v1217_v5 }
 0x3e7   : > { %1882 = vrcp.f32 %v1220_v30  ;;  %v1479_v30 = vlaneseq }
 0x3e8   : > { %1884 = vrcp.f32 %v1223_v37 }
 0x3e9   : > { %v1226_v38 = vpop.xlane.xlu1 %1225  ;;  %v1480_v5 = vshrl.u32 %v1479_v30, 7 }
 0x3ea   : > { %1886 = vrcp.f32 %v1226_v38 }
 0x3eb   : > { %v1481_v37 = vsub.s32 0, %v1480_v5 }
 0x3ed   : > { %v1229_v35 = vpop.xlane.xlu1 %1228 }
 0x3ee   : > { %1888 = vrcp.f32 %v1229_v35 }
 0x3f1   : > { %v1232_v20 = vpop.xlane.xlu1 %1231 }
 0x3f2   : > { %1890 = vrcp.f32 %v1232_v20 }
 0x3f3   : > { %v1881_v58 = vpop.eup %1880 }
 0x3f4   : > { %1415 = vxpose.xlu1.b32.start [1/16] (narrow) %v1881_v58, 8  ;;  %v1883_v2 = vpop.eup %1882 }
 0x3f5   : > { %v1235_v14 = vpop.xlane.xlu1 %1234  ;;  %v1885_v8 = vpop.eup %1884 }
 0x3f6   : > { %1892 = vrcp.f32 %v1235_v14 }
 0x3f7   : > { %v1887_v62 = vpop.eup %1886 }
 0x3f8   : > { %1416 = vxpose.xlu1.b32.cont [2/16] (narrow) %v1883_v2, 8 }
 0x3f9   : > { %v1238_v18 = vpop.xlane.xlu1 %1237 }
 0x3fa   : > { %1894 = vrcp.f32 %v1238_v18 }
 0x3fb   : > { %v1889_v1 = vpop.eup %1888 }
 0x3fc   : > { %1417 = vxpose.xlu1.b32.cont [3/16] (narrow) %v1885_v8, 8 }
 0x3fd   : > { %v1241_v57 = vpop.xlane.xlu1 %1240 }
 0x3fe   : > { %1896 = vrcp.f32 %v1241_v57 }
 0x3ff   : > { %v1891_v16 = vpop.eup %1890 }
 0x400   : > { %1418 = vxpose.xlu1.b32.cont [4/16] (narrow) %v1887_v62, 8 }
 0x401   : > { %v1244_v34 = vpop.xlane.xlu1 %1243 }
 0x402   : > { %1898 = vrcp.f32 %v1244_v34 }
 0x403   : > { %v1893_v21 = vpop.eup %1892 }
 0x404   : > { %1419 = vxpose.xlu1.b32.cont [5/16] (narrow) %v1889_v1, 8 }
 0x405   : > { %v1247_v17 = vpop.xlane.xlu1 %1246 }
 0x406   : > { %1900 = vrcp.f32 %v1247_v17 }
 0x407   : > { %v1895_v32 = vpop.eup %1894 }
 0x408   : > { %1420 = vxpose.xlu1.b32.cont [6/16] (narrow) %v1891_v16, 8 }
 0x409   : > { %v1250_v4 = vpop.xlane.xlu1 %1249 }
 0x40a   : > { %1902 = vrcp.f32 %v1250_v4 }
 0x40b   : > { %v1897_v0 = vpop.eup %1896 }
 0x40c   : > { %1421 = vxpose.xlu1.b32.cont [7/16] (narrow) %v1893_v21, 8 }
 0x40d   : > { %v1253_v10 = vpop.xlane.xlu1 %1252 }
 0x40e   : > { %1904 = vrcp.f32 %v1253_v10 }
 0x40f   : > { %v1899_v54 = vpop.eup %1898 }
 0x410   : > { %1422 = vxpose.xlu1.b32.cont [8/16] (narrow) %v1895_v32, 8 }
 0x411   : > { %v1256_v29 = vpop.xlane.xlu1 %1255 }
 0x412   : > { %1906 = vrcp.f32 %v1256_v29 }
 0x413   : > { %v1901_v7 = vpop.eup %1900 }
 0x414   : > { %1423 = vxpose.xlu1.b32.cont [9/16] (narrow) %v1897_v0, 8 }
 0x415   : > { %v1259_v56 = vpop.xlane.xlu1 %1258 }
 0x416   : > { %1908 = vrcp.f32 %v1259_v56 }
 0x417   : > { %v1903_v49 = vpop.eup %1902 }
 0x418   : > { %1424 = vxpose.xlu1.b32.cont [10/16] (narrow) %v1899_v54, 8 }
 0x419   : > { %v1262_v31 = vpop.xlane.xlu1 %1261 }
 0x41a   : > { %1910 = vrcp.f32 %v1262_v31 }
 0x41b   : > { %v1905_v50 = vpop.eup %1904 }
 0x41c   : > { %1425 = vxpose.xlu1.b32.cont [11/16] (narrow) %v1901_v7, 8 }
 0x41f   : > { %v1907_v12 = vpop.eup %1906 }
 0x420   : > { %1426 = vxpose.xlu1.b32.cont [12/16] (narrow) %v1903_v49, 8 }
 0x423   : > { %v1909_v63 = vpop.eup %1908 }
 0x424   : > { %1427 = vxpose.xlu1.b32.cont [13/16] (narrow) %v1905_v50, 8 }
 0x427   : > { %v1911_v52 = vpop.eup %1910 }
 0x428   : > { %1428 = vxpose.xlu1.b32.cont [14/16] (narrow) %v1907_v12, 8 }
 0x429   : > { %v1265_v24 = vpop.xlane.xlu0 %1264 }
 0x42a   : > { %1912 = vrcp.f32 %v1265_v24 }
 0x42c   : > { %1429 = vxpose.xlu1.b32.cont [15/16] (narrow) %v1909_v63, 8 }
 0x42d   : > { %v1268_v15 = vpop.xlane.xlu0 %1267 }
 0x42e   : > { %1914 = vrcp.f32 %v1268_v15 }
 0x430   : > { %1430 = vxpose.xlu1.b32.end [16/16] (narrow) %v1911_v52, 8 }
 0x431   : > { %v1271_v25 = vpop.xlane.xlu0 %1270 }
 0x432   : > { %1916 = vrcp.f32 %v1271_v25 }
 0x435   : > { %v1274_v9 = vpop.xlane.xlu0 %1273 }
 0x436   : > { %1918 = vrcp.f32 %v1274_v9 }
 0x437   : > { %v1913_v28 = vpop.eup %1912 }
 0x438   : > { %1447 = vxpose.xlu0.b32.start [1/16] (narrow) %v1913_v28, 8 }
 0x439   : > { %v1277_v46 = vpop.xlane.xlu0 %1276 }
 0x43a   : > { %1920 = vrcp.f32 %v1277_v46 }
 0x43b   : > { %v1915_v47 = vpop.eup %1914 }
 0x43c   : > { %1448 = vxpose.xlu0.b32.cont [2/16] (narrow) %v1915_v47, 8 }
 0x43d   : > { %v1280_v23 = vpop.xlane.xlu0 %1279 }
 0x43e   : > { %1922 = vrcp.f32 %v1280_v23 }
 0x43f   : > { %v1917_v13 = vpop.eup %1916 }
 0x440   : > { %1449 = vxpose.xlu0.b32.cont [3/16] (narrow) %v1917_v13, 8 }
 0x441   : > { %v1283_v33 = vpop.xlane.xlu0 %1282 }
 0x442   : > { %1924 = vrcp.f32 %v1283_v33 }
 0x443   : > { %v1919_v45 = vpop.eup %1918 }
 0x444   : > { %1450 = vxpose.xlu0.b32.cont [4/16] (narrow) %v1919_v45, 8 }
 0x445   : > { %v1286_v48 = vpop.xlane.xlu0 %1285 }
 0x446   : > { %1926 = vrcp.f32 %v1286_v48 }
 0x447   : > { %v1921_v3 = vpop.eup %1920 }
 0x448   : > { %1451 = vxpose.xlu0.b32.cont [5/16] (narrow) %v1921_v3, 8 }
 0x449   : > { %v1289_v11 = vpop.xlane.xlu0 %1288 }
 0x44a   : > { %1928 = vrcp.f32 %v1289_v11 }
 0x44b   : > { %v1923_v43 = vpop.eup %1922 }
 0x44c   : > { %1452 = vxpose.xlu0.b32.cont [6/16] (narrow) %v1923_v43, 8 }
 0x44d   : > { %v1292_v44 = vpop.xlane.xlu0 %1291 }
 0x44e   : > { %1930 = vrcp.f32 %v1292_v44 }
 0x44f   : > { %v1925_v26 = vpop.eup %1924 }
 0x450   : > { %1453 = vxpose.xlu0.b32.cont [7/16] (narrow) %v1925_v26, 8 }
 0x451   : > { %v1295_v42 = vpop.xlane.xlu0 %1294 }
 0x452   : > { %1932 = vrcp.f32 %v1295_v42 }
 0x453   : > { %v1927_v22 = vpop.eup %1926 }
 0x454   : > { %1454 = vxpose.xlu0.b32.cont [8/16] (narrow) %v1927_v22, 8 }
 0x455   : > { %v1298_v59 = vpop.xlane.xlu0 %1297 }
 0x456   : > { %1934 = vrcp.f32 %v1298_v59 }
 0x457   : > { %v1929_v6 = vpop.eup %1928 }
 0x458   : > { %1455 = vxpose.xlu0.b32.cont [9/16] (narrow) %v1929_v6, 8 }
 0x459   : > { %v1301_v19 = vpop.xlane.xlu0 %1300 }
 0x45a   : > { %1936 = vrcp.f32 %v1301_v19 }
 0x45b   : > { %v1931_v36 = vpop.eup %1930 }
 0x45c   : > { %1456 = vxpose.xlu0.b32.cont [10/16] (narrow) %v1931_v36, 8 }
 0x45d   : > { %v1304_v39 = vpop.xlane.xlu0 %1303 }
 0x45e   : > { %1938 = vrcp.f32 %v1304_v39 }
 0x45f   : > { %v1933_v40 = vpop.eup %1932 }
 0x460   : > { %1457 = vxpose.xlu0.b32.cont [11/16] (narrow) %v1933_v40, 8 }
 0x461   : > { %v1307_v41 = vpop.xlane.xlu0 %1306 }
 0x462   : > { %1940 = vrcp.f32 %v1307_v41  ;;  %v1378_v35 = vpop.f32.mrf.mxu1 }
 0x463   : > { %v1935_v55 = vpop.eup %1934 }
 0x464   : > { %1458 = vxpose.xlu0.b32.cont [12/16] (narrow) %v1935_v55, 8  ;;  %v1380_v2 = vpop.f32.mrf.mxu1 }
 0x465   : > { %v1310_v53 = vpop.xlane.xlu0 %1309 }
 0x466   : > { %1942 = vrcp.f32 %v1310_v53 }
 0x467   : > { %v1937_v60 = vpop.eup %1936 }
 0x468   : > { %1459 = vxpose.xlu0.b32.cont [13/16] (narrow) %v1937_v60, 8 }
 0x46b   : > { %v1939_v51 = vpop.eup %1938 }
 0x46c   : > { %1460 = vxpose.xlu0.b32.cont [14/16] (narrow) %v1939_v51, 8 }
 0x46f   : > { %v1941_v61 = vpop.eup %1940 }
 0x470   : > { %1461 = vxpose.xlu0.b32.cont [15/16] (narrow) %v1941_v61, 8  ;;  %v1431_v38 = vpop.trf.xlu1 }
 0x471   : > { %v1482_v20 = vrot.slane %v1431_v38, %v1481_v37 }
 0x473   : > { %v1943_v27 = vpop.eup %1942  ;;  %v1487_v18 = vmul.f32 %v1482_v20, %v1378_v35 }
 0x474   : > { %1462 = vxpose.xlu0.b32.end [16/16] (narrow) %v1943_v27, 8 }
 0x4b4   : > { %v1463_v58 = vpop.trf.xlu0 }
 0x4b5   : > { %v1486_v14 = vrot.slane %v1463_v58, %v1481_v37 }
 0x4b7   : > { %v1488_v8 = vmul.f32 %v1486_v14, %v1380_v2 }
 0x4b9   : > { %v1491_v57 = vcombine.low %v1487_v18, %v1488_v8 }
 0x4bb   : > { %1493 = vst [vmem:[%s323_s28] sm:$0xff] %v1491_v57 }
 0x4bc   : > { %2014 = shalt.err (!%p2011_p6)
}
 0x4bd   : > { %s2015_s14 = scalar_lea.hbm %s1509_s27, 128  ;;  %s2019_s16 = scalar_lea.hbm %s2732_s6, 256 }
 0x4be   : > { %p2016_p7 = scmp.ne.s32.totalorder %s1509_s27, %s2015_s14  ;;  %p2020_p4 = scmp.lt.s32.totalorder %s1509_s27, %s2732_s6 }
 0x4bf   : > { %p2021_p10 = scmp.lt.s32.totalorder %s2019_s16, %s2015_s14 }
 0x4c0   : > { %p2017_p1 = pnand %p2016_p7, %p2178_p9 }
 0x4c1   : > { %p2022_p8 = por %p2021_p10, %p2020_p4 }
 0x4c2   : > { %p2018_p2 = pneg %p2017_p1 }
 0x4c4   : > { %p2023_p0 = pnand %p2022_p8, %p2018_p2 }
 0x4c6   : > { %2026 = shalt.err (!%p2023_p0)
}
 0x4c7   : > { %1684 = dma.vmem_to_hbm [thread:$0]  (%p2178_p9), %s1512_s15, 128, %s1509_s27, %s1495_s17  }
 0x4c8 PF: > { %s1523_s20 = sand.u32 1, %s2065_s21   ;;  %p2782_p3 = scmp.ge.s32.totalorder %s2085_s26, 2 }
 0x4c9   : > { %s1524_s28 = scalar_lea.sflag [#allocation4], %s1523_s20 }
 0x4ca   : > { %p1694_p13 = pnand %p2782_p3, %p2185_p11 }
 0x4cc   : > { %p1695_p5 = pneg %p1694_p13 }
 0x4ce   : > { %2060 = dma.done.wait (%p1695_p5), %s1524_s28, 128  }
 0x4cf   : > { %2062 = vsyncadd (%p1695_p5), %s1524_s28, 4294967168  ;;  %s25_s26 = sadd.s32 1, %s2085_s26   ;;  %s2783_s10 = sld [smem:[#allocation11_spill]] }
 0x4d0   : > { %p22_p12 = scmp.ge.s32.totalorder %s25_s26, 4   ;;  %s2784_s21 = smov %s2069_s22 }
 0x4d1   : > { %s2785_s22 = smov %s2073_s23  ;;  %s2786_s23 = smov %s2183_s11 }
 0x4d2   : > { %s2787_s24 = smov %s2081_s25  ;;  %24 = sbr.rel (!%p22_p12) target bundleno = 10 (0xa), region = 102 }
 0x4d5   : > { %s2788_s25 = smov %s2783_s10 }
 0x4d7   :  { %1529 = vsyncpa [#allocation3], 1 }
 0x4d8   :  { %1531 = vsyncpa [#allocation3 + $0x1], 1 }
 0x4d9   :  { %1532 = vsyncpa [#allocation6], 1 }
 0x4da   :  { %1534 = vsyncpa [#allocation6 + $0x1], 1 }
 0x4db   :  { %1535 = vsyncpa [#allocation4], 1 }
 0x4dc   :  { %1537 = vsyncpa [#allocation4 + $0x1], 1 }

</bundles_post_ra>
